<compile_context>
chip_gen: v5e
topology: v5e:2x2
jax: 0.10.0
libtpu: 0.0.40
codegen_flags: <defaults>
</compile_context>

<pallas_src>
import math

import numpy as np
import jax
import jax.numpy as jnp
from jax import lax
from jax.experimental import pallas as pl
from jax.experimental.pallas import tpu as pltpu


# ----------------------------------------------------------------------------
# Fused forward kernel (whole batch, whole model, one invocation)
# ----------------------------------------------------------------------------
def make_fused_kernel(n_mod, fusion_dim, num_heads):
    M = n_mod
    F = fusion_dim
    H = num_heads
    Dh = F // H
    BMM = (((2,), (1,)), ((0,), (0,)))      # canonical (h,m,k)@(h,k,n)->(h,m,n)

    def kernel(*refs):
        x_refs = refs[:M]                   # (B*S_m, D_m) f32
        w_refs = refs[M:2 * M]              # (D_m, F)     bf16
        (pbias_ref,     # (M, F)     f32   per-modality projection biases
         mask_ref,      # (1, N, N)  f32   0 / -1e30 cross-batch mask
         wqkv_ref,      # (3F, F)    bf16  [Wq*scale; Wk; Wv]^T (head-major rows)
         bqkv_ref,      # (3F, 1)    f32   [bq*scale; bk; bv]
         woh_ref,       # (H, Dh, F) bf16  attention output projection (per head)
         bias2_ref,     # (2, F)     f32   row0 = attn-out bias, row1 = final bias
         pool_ref,      # (B*T, N)   bf16  adaptive_avg_pool1d as a matrix
         wout_ref,      # (F, F)     bf16  final Linear
         o_ref) = refs[2 * M:]              # (B*T, F)  f32

        # --- 1) per-modality Linear over ALL batch rows (modality-major) ----
        blocks = []
        for m in range(M):
            xm = x_refs[m][...].astype(jnp.bfloat16)
            pm = jnp.dot(xm, w_refs[m][...],
                         preferred_element_type=jnp.float32)
            blocks.append(pm + pbias_ref[m:m + 1, :])
        fused = blocks[0] if M == 1 else jnp.concatenate(blocks, axis=0)  # (N, F)

        # --- 2) fused QKV, computed TRANSPOSED so heads live on sublanes ----
        # (scale is already folded into the Q rows of wqkv / bqkv at init)
        fused_t = fused.T.astype(jnp.bfloat16)                            # (F, N)
        qkv_t = jnp.dot(wqkv_ref[...], fused_t,
                        preferred_element_type=jnp.float32) + bqkv_ref[...]  # (3F, N)

        # per-head views: cheap sublane slices + small 2-D transposes stacked
        # along a new major (head) axis -- pure layout plumbing, no lane slices.
        q_heads, k_heads, v_heads = [], [], []
        for h in range(H):
            q_heads.append(qkv_t[h * Dh:(h + 1) * Dh, :].T)               # (N, Dh)
            k_heads.append(qkv_t[F + h * Dh:F + (h + 1) * Dh, :])         # (Dh, N)
            v_heads.append(qkv_t[2 * F + h * Dh:2 * F + (h + 1) * Dh, :].T)
        qh = jnp.stack(q_heads, axis=0).astype(jnp.bfloat16)              # (H, N, Dh)
        kh = jnp.stack(k_heads, axis=0).astype(jnp.bfloat16)              # (H, Dh, N)
        vh = jnp.stack(v_heads, axis=0).astype(jnp.bfloat16)              # (H, N, Dh)

        # --- 3) head-batched attention; ONE softmax over the (H,N,N) block --
        # dropout(p=0.1) inside MultiHeadAttention is identity in eval mode.
        s = lax.dot_general(qh, kh, BMM,
                            preferred_element_type=jnp.float32)           # (H, N, N)
        s = s + mask_ref[...]                       # scores stay in f32
        s = s - jnp.max(s, axis=-1, keepdims=True)
        p = jnp.exp(s)
        p = p * pl.reciprocal(jnp.sum(p, axis=-1, keepdims=True), approx=True)
        ctx = lax.dot_general(p.astype(jnp.bfloat16), vh, BMM,
                              preferred_element_type=jnp.float32)         # (H, N, Dh)
        att_h = lax.dot_general(ctx.astype(jnp.bfloat16), woh_ref[...], BMM,
                                preferred_element_type=jnp.float32)       # (H, N, F)
        att = att_h[0]
        for h in range(1, H):                        # static, tiny: sum over heads
            att = att + att_h[h]
        att = att + bias2_ref[0:1, :]                                      # (N, F)

        # --- 4) adaptive_avg_pool1d (matmul) + output Linear -----------------
        pooled = jnp.dot(pool_ref[...], att.astype(jnp.bfloat16),
                         preferred_element_type=jnp.float32)               # (B*T, F)
        out = jnp.dot(pooled.astype(jnp.bfloat16), wout_ref[...],
                      preferred_element_type=jnp.float32) + bias2_ref[1:2, :]
        o_ref[...] = out.astype(o_ref.dtype)

    return kernel


# ----------------------------------------------------------------------------
# Module wrapper (parameter setup + host-side constants + compile cache)
# ----------------------------------------------------------------------------
def _lin_init(key, d_in, d_out):
    kw, kb = jax.random.split(key)
    w = 0.02 * jax.random.normal(kw, (d_in, d_out), jnp.float32)
    b = 0.02 * jax.random.normal(kb, (d_out,), jnp.float32)
    return w, b


class CrossModalFusionPallas:
    def __init__(self, modality_dims, fusion_dim=64, output_seq_length=8,
                 num_heads=8, key=None):
        assert fusion_dim % num_heads == 0
        self.fusion_dim = fusion_dim
        self.output_seq_length = output_seq_length
        self.num_heads = num_heads
        self.head_dim = fusion_dim // num_heads
        if key is None:
            key = jax.random.PRNGKey(0)

        M = len(modality_dims)
        F = fusion_dim
        keys = jax.random.split(key, M + 5)

        self._mod_names = tuple(modality_dims.keys())
        self.proj_w, self.proj_b = {}, {}
        for i, (name, dim) in enumerate(modality_dims.items()):
            w, b = _lin_init(keys[i], dim, F)
            self.proj_w[name] = w.astype(jnp.bfloat16)       # (D_m, F) bf16
            self.proj_b[name] = b                            # (F,)    f32

        wq, bq = _lin_init(keys[M + 0], F, F)
        wk, bk = _lin_init(keys[M + 1], F, F)
        wv, bv = _lin_init(keys[M + 2], F, F)
        wo, bo = _lin_init(keys[M + 3], F, F)
        wout, bout = _lin_init(keys[M + 4], F, F)

        scale = 1.0 / math.sqrt(self.head_dim)
        # fused QKV weight, transposed (out x in), attention scale folded into
        # the Q rows -> one in-kernel multiply removed.
        self.w_qkv_t = jnp.concatenate(
            [(wq * scale).T, wk.T, wv.T], axis=0).astype(jnp.bfloat16)    # (3F, F)
        self.b_qkv_t = jnp.concatenate(
            [bq * scale, bk, bv], axis=0).reshape(3 * F, 1)               # (3F, 1)
        # attention output projection, pre-split per head: (H, Dh, F)
        self.wo_h = wo.reshape(num_heads, self.head_dim, F).astype(jnp.bfloat16)
        self.w_out = wout.astype(jnp.bfloat16)                            # (F, F)
        self.bias2 = jnp.stack([bo, bout], axis=0)                        # (2, F)

        self._fwd_cache = {}     # (batch, seq_lens) -> jitted pallas_call
        self._const_cache = {}   # (batch, seq_lens) -> (mask, pool)
        self._pbias_cache = {}   # names tuple       -> (M, F) bias pack

    # -- host-side, cached constants -----------------------------------------
    def _consts(self, batch, seq_lens):
        key = (batch, seq_lens)
        if key not in self._const_cache:
            T = self.output_seq_length
            S = sum(seq_lens)
            N = batch * S
            # batch id of every row of the modality-major (N, F) slab, and the
            # modality-major row of every original (batch, seq-pos) pair.
            row_batch = np.zeros(N, np.int32)
            col_of = np.zeros((batch, S), np.int32)
            row_off = 0
            seq_off = 0
            for S_m in seq_lens:
                for b in range(batch):
                    r0 = row_off + b * S_m
                    row_batch[r0:r0 + S_m] = b
                    col_of[b, seq_off:seq_off + S_m] = np.arange(r0, r0 + S_m)
                row_off += batch * S_m
                seq_off += S_m
            mask = np.where(row_batch[:, None] == row_batch[None, :],
                            0.0, -1e30).astype(np.float32)[None]          # (1, N, N)
            # adaptive_avg_pool1d over the ORIGINAL sequence order, expressed
            # on the modality-major columns (identity windows when S == T).
            pool = np.zeros((batch * T, N), np.float32)
            for t in range(T):
                start = (t * S) // T
                end = -((-(t + 1) * S) // T)           # ceil((t+1)*S / T)
                w = 1.0 / (end - start)
                for b in range(batch):
                    pool[b * T + t, col_of[b, start:end]] = w
            self._const_cache[key] = (jnp.asarray(mask),
                                      jnp.asarray(pool, jnp.bfloat16))
        return self._const_cache[key]

    def _pbias(self, names):
        if names not in self._pbias_cache:
            self._pbias_cache[names] = jnp.stack(
                [self.proj_b[n] for n in names], axis=0)                   # (M, F)
        return self._pbias_cache[names]

    def _fwd(self, batch, seq_lens, n_mod):
        key = (batch, seq_lens)
        if key not in self._fwd_cache:
            T = self.output_seq_length
            F = self.fusion_dim
            kernel = make_fused_kernel(n_mod, F, self.num_heads)
            n_in = 2 * n_mod + 8
            pc = pl.pallas_call(
                kernel,
                out_shape=jax.ShapeDtypeStruct((batch * T, F), jnp.float32),
                in_specs=[pl.BlockSpec(memory_space=pltpu.MemorySpace.VMEM)] * n_in,
                out_specs=pl.BlockSpec(memory_space=pltpu.MemorySpace.VMEM),
            )
            # jit so repeated forwards at the same shapes hit the compile cache
            self._fwd_cache[key] = jax.jit(pc)
        return self._fwd_cache[key]

    # -- forward --------------------------------------------------------------
    def __call__(self, inputs, masks=None):
        # TODO(synk): masks / key_padding_mask path not implemented (ignored).
        xs, ws, names, seq_lens = [], [], [], []
        batch = None
        for name, x in inputs.items():
            if x.ndim == 2:                  # matches x.unsqueeze(1) in PyTorch
                x = x[:, None, :]
            batch = x.shape[0]
            s_m, d_m = x.shape[1], x.shape[2]
            names.append(name)
            seq_lens.append(s_m)
            xs.append(x.reshape(batch * s_m, d_m))    # free metadata reshape
            ws.append(self.proj_w[name])
        names = tuple(names)
        seq_lens = tuple(seq_lens)

        mask, pool = self._consts(batch, seq_lens)
        fwd = self._fwd(batch, seq_lens, len(names))
        out_flat = fwd(*xs, *ws, self._pbias(names), mask,
                       self.w_qkv_t, self.b_qkv_t, self.wo_h, self.bias2,
                       pool, self.w_out)
        # (B*T, F) -> (B, T, F): free reshape outside the kernel.
        return out_flat.reshape(batch, self.output_seq_length, self.fusion_dim)


# ----------------------------------------------------------------------------
if __name__ == "__main__":
    key = jax.random.PRNGKey(0)
    modality_dims = {"text": 32, "image": 48}
    seq_lens = {"text": 6, "image": 10}
    batch = 2
    fusion_dim = 64
    output_seq_length = 8    # != 16 total seq -> exercises the adaptive-pool path

    k_model, k_text, k_image = jax.random.split(key, 3)
    model = CrossModalFusionPallas(modality_dims, fusion_dim=fusion_dim,
                                   output_seq_length=output_seq_length,
                                   num_heads=8, key=k_model)

    inputs = {
        "text": jax.random.normal(k_text, (batch, seq_lens["text"],
                                           modality_dims["text"]), jnp.float32),
        "image": jax.random.normal(k_image, (batch, seq_lens["image"],
                                             modality_dims["image"]), jnp.float32),
    }

    out = model(inputs)
    out = jax.block_until_ready(out)
    # second forward: hits the cached jitted pallas_call (no retrace/recompile)
    out2 = jax.block_until_ready(model(inputs))

    assert out.shape == (batch, output_seq_length, fusion_dim), out.shape
    assert out2.shape == out.shape
    assert bool(jnp.all(jnp.isfinite(out)))
    print("KERNEL_OK")
</pallas_src>

<mosaic_0001>
module attributes {stable_mosaic.version = 11 : i64} {
  func.func @kernel(%arg0: memref<12x32xf32, #tpu.memory_space<vmem>>, %arg1: memref<20x48xf32, #tpu.memory_space<vmem>>, %arg2: memref<32x64xbf16, #tpu.memory_space<vmem>>, %arg3: memref<48x64xbf16, #tpu.memory_space<vmem>>, %arg4: memref<2x64xf32, #tpu.memory_space<vmem>>, %arg5: memref<1x32x32xf32, #tpu.memory_space<vmem>>, %arg6: memref<192x64xbf16, #tpu.memory_space<vmem>>, %arg7: memref<192x1xf32, #tpu.memory_space<vmem>>, %arg8: memref<8x8x64xbf16, #tpu.memory_space<vmem>>, %arg9: memref<2x64xf32, #tpu.memory_space<vmem>>, %arg10: memref<16x32xbf16, #tpu.memory_space<vmem>>, %arg11: memref<64x64xbf16, #tpu.memory_space<vmem>>, %arg12: memref<16x64xf32, #tpu.memory_space<vmem>>) attributes {dimension_semantics = [], scalar_prefetch = 0 : i64, scratch_operands = 0 : i64, tpu.core_type = #tpu.core_type<tc>} {
    %c0 = arith.constant 0 : index
    %c0_0 = arith.constant 0 : index
    %0 = vector.load %arg0[%c0, %c0_0] : memref<12x32xf32, #tpu.memory_space<vmem>>, vector<12x32xf32>
    %1 = arith.truncf %0 : vector<12x32xf32> to vector<12x32xbf16>
    %c0_1 = arith.constant 0 : index
    %c0_2 = arith.constant 0 : index
    %2 = vector.load %arg2[%c0_1, %c0_2] : memref<32x64xbf16, #tpu.memory_space<vmem>>, vector<32x64xbf16>
    %cst = arith.constant dense<0.000000e+00> : vector<12x64xf32>
    %3 = tpu.matmul %1, %2, %cst {dimension_numbers = #tpu.dot_dimension_numbers<[1], [0], [0], [1], [0, 0, 1, 1], [], []>} : vector<12x32xbf16>, vector<32x64xbf16>, vector<12x64xf32> -> vector<12x64xf32>
    %c0_3 = arith.constant 0 : index
    %c0_4 = arith.constant 0 : index
    %4 = vector.load %arg4[%c0_3, %c0_4] : memref<2x64xf32, #tpu.memory_space<vmem>>, vector<1x64xf32>
    %5 = vector.broadcast %4 : vector<1x64xf32> to vector<12x64xf32>
    %6 = arith.addf %3, %5 : vector<12x64xf32>
    %c0_5 = arith.constant 0 : index
    %c0_6 = arith.constant 0 : index
    %7 = vector.load %arg1[%c0_5, %c0_6] : memref<20x48xf32, #tpu.memory_space<vmem>>, vector<20x48xf32>
    %8 = arith.truncf %7 : vector<20x48xf32> to vector<20x48xbf16>
    %c0_7 = arith.constant 0 : index
    %c0_8 = arith.constant 0 : index
    %9 = vector.load %arg3[%c0_7, %c0_8] : memref<48x64xbf16, #tpu.memory_space<vmem>>, vector<48x64xbf16>
    %cst_9 = arith.constant dense<0.000000e+00> : vector<20x64xf32>
    %10 = tpu.matmul %8, %9, %cst_9 {dimension_numbers = #tpu.dot_dimension_numbers<[1], [0], [0], [1], [0, 0, 1, 1], [], []>} : vector<20x48xbf16>, vector<48x64xbf16>, vector<20x64xf32> -> vector<20x64xf32>
    %c1 = arith.constant 1 : index
    %c0_10 = arith.constant 0 : index
    %11 = vector.load %arg4[%c1, %c0_10] : memref<2x64xf32, #tpu.memory_space<vmem>>, vector<1x64xf32>
    %12 = vector.broadcast %11 : vector<1x64xf32> to vector<20x64xf32>
    %13 = arith.addf %10, %12 : vector<20x64xf32>
    %14 = tpu.concatenate %6, %13 in 0 : vector<12x64xf32>, vector<20x64xf32> -> vector<32x64xf32>
    %15 = tpu.transpose %14, [1, 0] : vector<32x64xf32> -> vector<64x32xf32>
    %16 = arith.truncf %15 : vector<64x32xf32> to vector<64x32xbf16>
    %c0_11 = arith.constant 0 : index
    %c0_12 = arith.constant 0 : index
    %17 = vector.load %arg6[%c0_11, %c0_12] : memref<192x64xbf16, #tpu.memory_space<vmem>>, vector<192x64xbf16>
    %cst_13 = arith.constant dense<0.000000e+00> : vector<192x32xf32>
    %18 = tpu.matmul %17, %16, %cst_13 {dimension_numbers = #tpu.dot_dimension_numbers<[1], [0], [0], [1], [0, 0, 1, 1], [], []>} : vector<192x64xbf16>, vector<64x32xbf16>, vector<192x32xf32> -> vector<192x32xf32>
    %c0_14 = arith.constant 0 : index
    %c0_15 = arith.constant 0 : index
    %19 = vector.load %arg7[%c0_14, %c0_15] : memref<192x1xf32, #tpu.memory_space<vmem>>, vector<192x1xf32>
    %20 = vector.broadcast %19 : vector<192x1xf32> to vector<192x32xf32>
    %21 = arith.addf %18, %20 : vector<192x32xf32>
    %22 = vector.extract_strided_slice %21 {offsets = [0, 0], sizes = [8, 32], strides = [1, 1]} : vector<192x32xf32> to vector<8x32xf32>
    %23 = tpu.transpose %22, [1, 0] : vector<8x32xf32> -> vector<32x8xf32>
    %24 = vector.extract_strided_slice %21 {offsets = [64, 0], sizes = [8, 32], strides = [1, 1]} : vector<192x32xf32> to vector<8x32xf32>
    %25 = vector.extract_strided_slice %21 {offsets = [128, 0], sizes = [8, 32], strides = [1, 1]} : vector<192x32xf32> to vector<8x32xf32>
    %26 = tpu.transpose %25, [1, 0] : vector<8x32xf32> -> vector<32x8xf32>
    %27 = vector.extract_strided_slice %21 {offsets = [8, 0], sizes = [8, 32], strides = [1, 1]} : vector<192x32xf32> to vector<8x32xf32>
    %28 = tpu.transpose %27, [1, 0] : vector<8x32xf32> -> vector<32x8xf32>
    %29 = vector.extract_strided_slice %21 {offsets = [72, 0], sizes = [8, 32], strides = [1, 1]} : vector<192x32xf32> to vector<8x32xf32>
    %30 = vector.extract_strided_slice %21 {offsets = [136, 0], sizes = [8, 32], strides = [1, 1]} : vector<192x32xf32> to vector<8x32xf32>
    %31 = tpu.transpose %30, [1, 0] : vector<8x32xf32> -> vector<32x8xf32>
    %32 = vector.extract_strided_slice %21 {offsets = [16, 0], sizes = [8, 32], strides = [1, 1]} : vector<192x32xf32> to vector<8x32xf32>
    %33 = tpu.transpose %32, [1, 0] : vector<8x32xf32> -> vector<32x8xf32>
    %34 = vector.extract_strided_slice %21 {offsets = [80, 0], sizes = [8, 32], strides = [1, 1]} : vector<192x32xf32> to vector<8x32xf32>
    %35 = vector.extract_strided_slice %21 {offsets = [144, 0], sizes = [8, 32], strides = [1, 1]} : vector<192x32xf32> to vector<8x32xf32>
    %36 = tpu.transpose %35, [1, 0] : vector<8x32xf32> -> vector<32x8xf32>
    %37 = vector.extract_strided_slice %21 {offsets = [24, 0], sizes = [8, 32], strides = [1, 1]} : vector<192x32xf32> to vector<8x32xf32>
    %38 = tpu.transpose %37, [1, 0] : vector<8x32xf32> -> vector<32x8xf32>
    %39 = vector.extract_strided_slice %21 {offsets = [88, 0], sizes = [8, 32], strides = [1, 1]} : vector<192x32xf32> to vector<8x32xf32>
    %40 = vector.extract_strided_slice %21 {offsets = [152, 0], sizes = [8, 32], strides = [1, 1]} : vector<192x32xf32> to vector<8x32xf32>
    %41 = tpu.transpose %40, [1, 0] : vector<8x32xf32> -> vector<32x8xf32>
    %42 = vector.extract_strided_slice %21 {offsets = [32, 0], sizes = [8, 32], strides = [1, 1]} : vector<192x32xf32> to vector<8x32xf32>
    %43 = tpu.transpose %42, [1, 0] : vector<8x32xf32> -> vector<32x8xf32>
    %44 = vector.extract_strided_slice %21 {offsets = [96, 0], sizes = [8, 32], strides = [1, 1]} : vector<192x32xf32> to vector<8x32xf32>
    %45 = vector.extract_strided_slice %21 {offsets = [160, 0], sizes = [8, 32], strides = [1, 1]} : vector<192x32xf32> to vector<8x32xf32>
    %46 = tpu.transpose %45, [1, 0] : vector<8x32xf32> -> vector<32x8xf32>
    %47 = vector.extract_strided_slice %21 {offsets = [40, 0], sizes = [8, 32], strides = [1, 1]} : vector<192x32xf32> to vector<8x32xf32>
    %48 = tpu.transpose %47, [1, 0] : vector<8x32xf32> -> vector<32x8xf32>
    %49 = vector.extract_strided_slice %21 {offsets = [104, 0], sizes = [8, 32], strides = [1, 1]} : vector<192x32xf32> to vector<8x32xf32>
    %50 = vector.extract_strided_slice %21 {offsets = [168, 0], sizes = [8, 32], strides = [1, 1]} : vector<192x32xf32> to vector<8x32xf32>
    %51 = tpu.transpose %50, [1, 0] : vector<8x32xf32> -> vector<32x8xf32>
    %52 = vector.extract_strided_slice %21 {offsets = [48, 0], sizes = [8, 32], strides = [1, 1]} : vector<192x32xf32> to vector<8x32xf32>
    %53 = tpu.transpose %52, [1, 0] : vector<8x32xf32> -> vector<32x8xf32>
    %54 = vector.extract_strided_slice %21 {offsets = [112, 0], sizes = [8, 32], strides = [1, 1]} : vector<192x32xf32> to vector<8x32xf32>
    %55 = vector.extract_strided_slice %21 {offsets = [176, 0], sizes = [8, 32], strides = [1, 1]} : vector<192x32xf32> to vector<8x32xf32>
    %56 = tpu.transpose %55, [1, 0] : vector<8x32xf32> -> vector<32x8xf32>
    %57 = vector.extract_strided_slice %21 {offsets = [56, 0], sizes = [8, 32], strides = [1, 1]} : vector<192x32xf32> to vector<8x32xf32>
    %58 = tpu.transpose %57, [1, 0] : vector<8x32xf32> -> vector<32x8xf32>
    %59 = vector.extract_strided_slice %21 {offsets = [120, 0], sizes = [8, 32], strides = [1, 1]} : vector<192x32xf32> to vector<8x32xf32>
    %60 = vector.extract_strided_slice %21 {offsets = [184, 0], sizes = [8, 32], strides = [1, 1]} : vector<192x32xf32> to vector<8x32xf32>
    %61 = tpu.transpose %60, [1, 0] : vector<8x32xf32> -> vector<32x8xf32>
    %62 = vector.shape_cast %23 : vector<32x8xf32> to vector<1x32x8xf32>
    %63 = vector.shape_cast %28 : vector<32x8xf32> to vector<1x32x8xf32>
    %64 = vector.shape_cast %33 : vector<32x8xf32> to vector<1x32x8xf32>
    %65 = vector.shape_cast %38 : vector<32x8xf32> to vector<1x32x8xf32>
    %66 = vector.shape_cast %43 : vector<32x8xf32> to vector<1x32x8xf32>
    %67 = vector.shape_cast %48 : vector<32x8xf32> to vector<1x32x8xf32>
    %68 = vector.shape_cast %53 : vector<32x8xf32> to vector<1x32x8xf32>
    %69 = vector.shape_cast %58 : vector<32x8xf32> to vector<1x32x8xf32>
    %70 = tpu.concatenate %62, %63, %64, %65, %66, %67, %68, %69 in 0 : vector<1x32x8xf32>, vector<1x32x8xf32>, vector<1x32x8xf32>, vector<1x32x8xf32>, vector<1x32x8xf32>, vector<1x32x8xf32>, vector<1x32x8xf32>, vector<1x32x8xf32> -> vector<8x32x8xf32>
    %71 = arith.truncf %70 : vector<8x32x8xf32> to vector<8x32x8xbf16>
    %72 = vector.shape_cast %24 : vector<8x32xf32> to vector<1x8x32xf32>
    %73 = vector.shape_cast %29 : vector<8x32xf32> to vector<1x8x32xf32>
    %74 = vector.shape_cast %34 : vector<8x32xf32> to vector<1x8x32xf32>
    %75 = vector.shape_cast %39 : vector<8x32xf32> to vector<1x8x32xf32>
    %76 = vector.shape_cast %44 : vector<8x32xf32> to vector<1x8x32xf32>
    %77 = vector.shape_cast %49 : vector<8x32xf32> to vector<1x8x32xf32>
    %78 = vector.shape_cast %54 : vector<8x32xf32> to vector<1x8x32xf32>
    %79 = vector.shape_cast %59 : vector<8x32xf32> to vector<1x8x32xf32>
    %80 = tpu.concatenate %72, %73, %74, %75, %76, %77, %78, %79 in 0 : vector<1x8x32xf32>, vector<1x8x32xf32>, vector<1x8x32xf32>, vector<1x8x32xf32>, vector<1x8x32xf32>, vector<1x8x32xf32>, vector<1x8x32xf32>, vector<1x8x32xf32> -> vector<8x8x32xf32>
    %81 = arith.truncf %80 : vector<8x8x32xf32> to vector<8x8x32xbf16>
    %82 = vector.shape_cast %26 : vector<32x8xf32> to vector<1x32x8xf32>
    %83 = vector.shape_cast %31 : vector<32x8xf32> to vector<1x32x8xf32>
    %84 = vector.shape_cast %36 : vector<32x8xf32> to vector<1x32x8xf32>
    %85 = vector.shape_cast %41 : vector<32x8xf32> to vector<1x32x8xf32>
    %86 = vector.shape_cast %46 : vector<32x8xf32> to vector<1x32x8xf32>
    %87 = vector.shape_cast %51 : vector<32x8xf32> to vector<1x32x8xf32>
    %88 = vector.shape_cast %56 : vector<32x8xf32> to vector<1x32x8xf32>
    %89 = vector.shape_cast %61 : vector<32x8xf32> to vector<1x32x8xf32>
    %90 = tpu.concatenate %82, %83, %84, %85, %86, %87, %88, %89 in 0 : vector<1x32x8xf32>, vector<1x32x8xf32>, vector<1x32x8xf32>, vector<1x32x8xf32>, vector<1x32x8xf32>, vector<1x32x8xf32>, vector<1x32x8xf32>, vector<1x32x8xf32> -> vector<8x32x8xf32>
    %91 = arith.truncf %90 : vector<8x32x8xf32> to vector<8x32x8xbf16>
    %cst_16 = arith.constant dense<0.000000e+00> : vector<8x32x32xf32>
    %92 = tpu.matmul %71, %81, %cst_16 {dimension_numbers = #tpu.dot_dimension_numbers<[2], [1], [1], [2], [0, 0, 0, 1, 1, 2], [0], [0]>} : vector<8x32x8xbf16>, vector<8x8x32xbf16>, vector<8x32x32xf32> -> vector<8x32x32xf32>
    %c0_17 = arith.constant 0 : index
    %c0_18 = arith.constant 0 : index
    %c0_19 = arith.constant 0 : index
    %93 = vector.load %arg5[%c0_17, %c0_18, %c0_19] : memref<1x32x32xf32, #tpu.memory_space<vmem>>, vector<1x32x32xf32>
    %94 = vector.broadcast %93 : vector<1x32x32xf32> to vector<8x32x32xf32>
    %95 = arith.addf %92, %94 : vector<8x32x32xf32>
    %cst_20 = arith.constant dense<0xFF800000> : vector<8x32xf32>
    %96 = vector.multi_reduction <maximumf>, %95, %cst_20 [2] : vector<8x32x32xf32> to vector<8x32xf32>
    %97 = vector.shape_cast %96 : vector<8x32xf32> to vector<8x32x1xf32>
    %98 = vector.broadcast %97 : vector<8x32x1xf32> to vector<8x32x32xf32>
    %99 = arith.subf %95, %98 : vector<8x32x32xf32>
    %100 = math.exp %99 : vector<8x32x32xf32>
    %cst_21 = arith.constant dense<0.000000e+00> : vector<8x32xf32>
    %101 = vector.multi_reduction <add>, %100, %cst_21 [2] : vector<8x32x32xf32> to vector<8x32xf32>
    %102 = vector.shape_cast %101 : vector<8x32xf32> to vector<8x32x1xf32>
    %103 = tpu.reciprocal %102 {approx = true} : vector<8x32x1xf32> -> vector<8x32x1xf32>
    %104 = vector.broadcast %103 : vector<8x32x1xf32> to vector<8x32x32xf32>
    %105 = arith.mulf %100, %104 : vector<8x32x32xf32>
    %106 = arith.truncf %105 : vector<8x32x32xf32> to vector<8x32x32xbf16>
    %cst_22 = arith.constant dense<0.000000e+00> : vector<8x32x8xf32>
    %107 = tpu.matmul %106, %91, %cst_22 {dimension_numbers = #tpu.dot_dimension_numbers<[2], [1], [1], [2], [0, 0, 0, 1, 1, 2], [0], [0]>} : vector<8x32x32xbf16>, vector<8x32x8xbf16>, vector<8x32x8xf32> -> vector<8x32x8xf32>
    %108 = arith.truncf %107 : vector<8x32x8xf32> to vector<8x32x8xbf16>
    %c0_23 = arith.constant 0 : index
    %c0_24 = arith.constant 0 : index
    %c0_25 = arith.constant 0 : index
    %109 = vector.load %arg8[%c0_23, %c0_24, %c0_25] : memref<8x8x64xbf16, #tpu.memory_space<vmem>>, vector<8x8x64xbf16>
    %cst_26 = arith.constant dense<0.000000e+00> : vector<8x32x64xf32>
    %110 = tpu.matmul %108, %109, %cst_26 {dimension_numbers = #tpu.dot_dimension_numbers<[2], [1], [1], [2], [0, 0, 0, 1, 1, 2], [0], [0]>} : vector<8x32x8xbf16>, vector<8x8x64xbf16>, vector<8x32x64xf32> -> vector<8x32x64xf32>
    %111 = vector.extract_strided_slice %110 {offsets = [0, 0, 0], sizes = [1, 32, 64], strides = [1, 1, 1]} : vector<8x32x64xf32> to vector<1x32x64xf32>
    %112 = vector.shape_cast %111 : vector<1x32x64xf32> to vector<32x64xf32>
    %113 = vector.extract_strided_slice %110 {offsets = [1, 0, 0], sizes = [1, 32, 64], strides = [1, 1, 1]} : vector<8x32x64xf32> to vector<1x32x64xf32>
    %114 = vector.shape_cast %113 : vector<1x32x64xf32> to vector<32x64xf32>
    %115 = arith.addf %112, %114 : vector<32x64xf32>
    %116 = vector.extract_strided_slice %110 {offsets = [2, 0, 0], sizes = [1, 32, 64], strides = [1, 1, 1]} : vector<8x32x64xf32> to vector<1x32x64xf32>
    %117 = vector.shape_cast %116 : vector<1x32x64xf32> to vector<32x64xf32>
    %118 = arith.addf %115, %117 : vector<32x64xf32>
    %119 = vector.extract_strided_slice %110 {offsets = [3, 0, 0], sizes = [1, 32, 64], strides = [1, 1, 1]} : vector<8x32x64xf32> to vector<1x32x64xf32>
    %120 = vector.shape_cast %119 : vector<1x32x64xf32> to vector<32x64xf32>
    %121 = arith.addf %118, %120 : vector<32x64xf32>
    %122 = vector.extract_strided_slice %110 {offsets = [4, 0, 0], sizes = [1, 32, 64], strides = [1, 1, 1]} : vector<8x32x64xf32> to vector<1x32x64xf32>
    %123 = vector.shape_cast %122 : vector<1x32x64xf32> to vector<32x64xf32>
    %124 = arith.addf %121, %123 : vector<32x64xf32>
    %125 = vector.extract_strided_slice %110 {offsets = [5, 0, 0], sizes = [1, 32, 64], strides = [1, 1, 1]} : vector<8x32x64xf32> to vector<1x32x64xf32>
    %126 = vector.shape_cast %125 : vector<1x32x64xf32> to vector<32x64xf32>
    %127 = arith.addf %124, %126 : vector<32x64xf32>
    %128 = vector.extract_strided_slice %110 {offsets = [6, 0, 0], sizes = [1, 32, 64], strides = [1, 1, 1]} : vector<8x32x64xf32> to vector<1x32x64xf32>
    %129 = vector.shape_cast %128 : vector<1x32x64xf32> to vector<32x64xf32>
    %130 = arith.addf %127, %129 : vector<32x64xf32>
    %131 = vector.extract_strided_slice %110 {offsets = [7, 0, 0], sizes = [1, 32, 64], strides = [1, 1, 1]} : vector<8x32x64xf32> to vector<1x32x64xf32>
    %132 = vector.shape_cast %131 : vector<1x32x64xf32> to vector<32x64xf32>
    %133 = arith.addf %130, %132 : vector<32x64xf32>
    %c0_27 = arith.constant 0 : index
    %c0_28 = arith.constant 0 : index
    %134 = vector.load %arg9[%c0_27, %c0_28] : memref<2x64xf32, #tpu.memory_space<vmem>>, vector<1x64xf32>
    %135 = vector.broadcast %134 : vector<1x64xf32> to vector<32x64xf32>
    %136 = arith.addf %133, %135 : vector<32x64xf32>
    %c0_29 = arith.constant 0 : index
    %c0_30 = arith.constant 0 : index
    %137 = vector.load %arg10[%c0_29, %c0_30] : memref<16x32xbf16, #tpu.memory_space<vmem>>, vector<16x32xbf16>
    %138 = arith.truncf %136 : vector<32x64xf32> to vector<32x64xbf16>
    %cst_31 = arith.constant dense<0.000000e+00> : vector<16x64xf32>
    %139 = tpu.matmul %137, %138, %cst_31 {dimension_numbers = #tpu.dot_dimension_numbers<[1], [0], [0], [1], [0, 0, 1, 1], [], []>} : vector<16x32xbf16>, vector<32x64xbf16>, vector<16x64xf32> -> vector<16x64xf32>
    %140 = arith.truncf %139 : vector<16x64xf32> to vector<16x64xbf16>
    %c0_32 = arith.constant 0 : index
    %c0_33 = arith.constant 0 : index
    %141 = vector.load %arg11[%c0_32, %c0_33] : memref<64x64xbf16, #tpu.memory_space<vmem>>, vector<64x64xbf16>
    %cst_34 = arith.constant dense<0.000000e+00> : vector<16x64xf32>
    %142 = tpu.matmul %140, %141, %cst_34 {dimension_numbers = #tpu.dot_dimension_numbers<[1], [0], [0], [1], [0, 0, 1, 1], [], []>} : vector<16x64xbf16>, vector<64x64xbf16>, vector<16x64xf32> -> vector<16x64xf32>
    %c1_35 = arith.constant 1 : index
    %c0_36 = arith.constant 0 : index
    %143 = vector.load %arg9[%c1_35, %c0_36] : memref<2x64xf32, #tpu.memory_space<vmem>>, vector<1x64xf32>
    %144 = vector.broadcast %143 : vector<1x64xf32> to vector<16x64xf32>
    %145 = arith.addf %142, %144 : vector<16x64xf32>
    %c0_37 = arith.constant 0 : index
    %c0_38 = arith.constant 0 : index
    %146 = vector.load %arg12[%c0_37, %c0_38] : memref<16x64xf32, #tpu.memory_space<vmem>>, vector<16x64xf32>
    tpu.vector_store %arg12[%c0_37, %c0_38], %145 {strides = array<i32>} : memref<16x64xf32, #tpu.memory_space<vmem>>, vector<16x64xf32>,
    return
  }
}

</mosaic_0001>

<bundles_post_ra>
// kernel: tpu_custom_call.1
= control target key start
LH: loop header
LB: loop body
LE: loop exit
PB: predicated region body
PF: predicated region fallthrough
CT: control target
= control target key end

     0   :  { %s4044_s0 = inlined_call_operand.vmem [shape: f32[12,32], index: 0, kind: input, shape index: {}]   ;;  %s4045_s1 = inlined_call_operand.vmem [shape: f32[20,48], index: 1, kind: input, shape index: {}]   ;;  %s4046_s2 = inlined_call_operand.vmem [shape: bf16[32,64], index: 2, kind: input, shape index: {}]   ;;  %s4047_s3 = inlined_call_operand.vmem [shape: bf16[48,64], index: 3, kind: input, shape index: {}]   ;;  %s4048_s4 = inlined_call_operand.vmem [shape: f32[2,64], index: 4, kind: input, shape index: {}]   ;;  %s4049_s5 = inlined_call_operand.vmem [shape: f32[1,32,32], index: 5, kind: input, shape index: {}]   ;;  %s4050_s6 = inlined_call_operand.vmem [shape: bf16[192,64], index: 6, kind: input, shape index: {}]   ;;  %s4051_s7 = inlined_call_operand.vmem [shape: f32[192,1], index: 7, kind: input, shape index: {}]   ;;  %s4052_s8 = inlined_call_operand.vmem [shape: bf16[8,8,64], index: 8, kind: input, shape index: {}]   ;;  %s4053_s9 = inlined_call_operand.vmem [shape: f32[2,64], index: 9, kind: input, shape index: {}]   ;;  %s4054_s10 = inlined_call_operand.vmem [shape: bf16[16,32], index: 10, kind: input, shape index: {}]   ;;  %s4055_s11 = inlined_call_operand.vmem [shape: bf16[64,64], index: 11, kind: input, shape index: {}]   ;;  %s4056_s12 = inlined_call_operand.hbm [shape: f32[16,64], index: 12, kind: output, shape index: {}]  }
   0x1   :  { %v2804_v0 = vld [vmem:[%s4046_s2 + $0x8] sm:$0xff]  ;;  %v2807_v1 = vld [vmem:[%s4047_s3 + $0x10] sm:$0xff]  ;;  %v2803_v2 = vld [vmem:[%s4046_s2] sm:$0xff] }
   0x2   :  { %74 = vmatpush.bf16.msra.mxu0 %v2804_v0  ;;  %125 = vmatpush.bf16.msra.mxu1 %v2807_v1  ;;  %v2806_v3 = vld [vmem:[%s4047_s3 + $0x8] sm:$0xff]  ;;  %v43_v4 = vld [vmem:[%s4044_s0] sm:$0xff] }
   0x3   :  { %v44_v5 = vld [vmem:[%s4044_s0 + $0x8] sm:$0xf] }
   0x4   :  { %17 = vsyncpa [#allocation3], 0  ;;  %v45_v6 = vpack.c.bf16 %v44_v5, %v43_v4  ;;  %vm64_vm0 = vcmask 261120   ;;  %v2805_v7 = vld [vmem:[%s4047_s3] sm:$0xff]  ;;  %v83_v9 = vld [vmem:[%s4045_s1 + $0x8] sm:$0xff]  ;;  %vm113_vm1 = vcmask 392192  }
   0x5   :  { %v82_v8 = vld [vmem:[%s4045_s1] sm:$0xff]  ;;  %v84_v11 = vld [vmem:[%s4045_s1 + $0x10] sm:$0xf]  ;;  %vm141_vm2 = vcmask 1043456   ;;  %v3167_v35 = vmov 0   ;;  %v212_v37 = vld [vmem:[%s4051_s7 + $0x8] sm:$0xff] }
   0x6   :  { %75 = vmatpush.bf16.msra.mxu0 %v2803_v2  ;;  %126 = vmatpush.bf16.msra.mxu1 %v2806_v3  ;;  %v85_v10 = vpack.c.bf16 %v83_v9, %v82_v8  ;;  %v86_v12 = vpack.c.bf16 %v84_v11, %v84_v11  ;;  %v3009_v13 = vld [vmem:[%s4048_s4] ss:$0 sm:$0xff]  ;;  %v3010_v16 = vld [vmem:[%s4048_s4 + $0x1] ss:$0 sm:$0xff]  ;;  %v213_v39 = vld [vmem:[%s4051_s7 + $0x10] sm:$0xff]  ;;  %vm415_vm3 = vcmask 523264  }
   0x7   :  { %v211_v34 = vld [vmem:[%s4051_s7] sm:$0xff]  ;;  %2830 = vset.pattern.permute.xlu1 %v3167_v35  ;;  %2831 = vset.pattern.permute.xlu2 %v3167_v35  ;;  %v218_v41 = vld [vmem:[%s4051_s7 + $0x38] sm:$0xff]  ;;  %v225_v43 = vld [vmem:[%s4051_s7 + $0x70] sm:$0xff]  ;;  %vm1119_vm4 = vcmask 64512   ;;  %s3168_s14 = smov [#allocation2]   ;;  %s3169_s17 = smov 128  }
   0x8   :  { %237 = vperm.xlu1 %2830, %v211_v34   ;;  %v226_v45 = vld [vmem:[%s4051_s7 + $0x78] sm:$0xff]  ;;  %v231_v48 = vld [vmem:[%s4051_s7 + $0xa0] sm:$0xff]  ;;  %v220_v52 = vld [vmem:[%s4051_s7 + $0x48] sm:$0xff]  ;;  %s2636_s2 = sshll.u32 %s3168_s14, 4  ;;  %s3170_s18 = smov 8   ;;  %s2637_s2 = int_to_ptr.vmem [resolvable:$true] %s2636_s2 }
   0x9   :  { %2658 = vmatmul.msk.bf16.vlgmr.msra.gmra.mxu0 %vm64_vm0, %v45_v6  ;;  %v219_v49 = vld [vmem:[%s4051_s7 + $0x40] sm:$0xff]  ;;  %v214_v55 = vld [vmem:[%s4051_s7 + $0x18] sm:$0xff]  ;;  %v2809_v57 = vld [vmem:[%s4050_s6 + $0x8] sm:$0xff] }
   0xa   :  { %127 = vmatpush.bf16.msra.mxu1 %v2805_v7  ;;  %277 = vperm.xlu2 %2831, %v219_v49   ;;  %v2808_v54 = vld [vmem:[%s4050_s6] sm:$0xff]  ;;  %v222_v58 = vld [vmem:[%s4051_s7 + $0x58] sm:$0xff]  ;;  %v2810_v60 = vld [vmem:[%s4050_s6 + $0x10] sm:$0xff] }
   0xb   :  { %v215_v56 = vld [vmem:[%s4051_s7 + $0x20] sm:$0xff]  ;;  %v216_v61 = vld [vmem:[%s4051_s7 + $0x28] sm:$0xff]  ;;  %v217_v62 = vld [vmem:[%s4051_s7 + $0x30] sm:$0xff] }
   0xc   :  { %v223_v59 = vld [vmem:[%s4051_s7 + $0x60] sm:$0xff]  ;;  %v2811_v63 = vld [vmem:[%s4050_s6 + $0x18] sm:$0xff]  ;;  %v224_v0 = vld [vmem:[%s4051_s7 + $0x68] sm:$0xff] }
   0xd   :  { %2671 = vmatmul.msk.bf16.vlgmr.msra.gmra.mxu1 %vm113_vm1, %v85_v10  ;;  %v227_v1 = vld [vmem:[%s4051_s7 + $0x80] sm:$0xff]  ;;  %v229_v3 = vld [vmem:[%s4051_s7 + $0x90] sm:$0xff]  ;;  %v2813_v6 = vld [vmem:[%s4050_s6 + $0x28] sm:$0xff] }
   0xe   :  { %v2812_v2 = vld [vmem:[%s4050_s6 + $0x20] sm:$0xff]  ;;  %v221_v4 = vld [vmem:[%s4051_s7 + $0x50] sm:$0xff]  ;;  %v228_v7 = vld [vmem:[%s4051_s7 + $0x88] sm:$0xff] }
   0xf   :  { %v233_v5 = vld [vmem:[%s4051_s7 + $0xb0] sm:$0xff]  ;;  %v230_v8 = vld [vmem:[%s4051_s7 + $0x98] sm:$0xff]  ;;  %v232_v10 = vld [vmem:[%s4051_s7 + $0xa8] sm:$0xff] }
  0x10   :  { %242 = vperm.xlu1 %2830, %v212_v37   ;;  %v2814_v9 = vld [vmem:[%s4050_s6 + $0x30] sm:$0xff]  ;;  %v2815_v11 = vld [vmem:[%s4050_s6 + $0x38] sm:$0xff] }
  0x12   :  { %282 = vperm.xlu2 %2831, %v220_v52  }
  0x18   :  { %247 = vperm.xlu1 %2830, %v213_v39  }
  0x1a   :  { %252 = vperm.xlu2 %2831, %v214_v55  }
  0x1d   :  { %2672 = vmatmul.msk.bf16.gmra.mxu1 %vm113_vm1, %v86_v12  ;;  %v234_v12 = vld [vmem:[%s4051_s7 + $0xb8] sm:$0xff] }
  0x20   :  { %272 = vperm.xlu1 %2830, %v218_v41  }
  0x22   :  { %257 = vperm.xlu2 %2831, %v215_v56  }
  0x28   :  { %307 = vperm.xlu1 %2830, %v225_v43  }
  0x2a   :  { %292 = vperm.xlu2 %2831, %v222_v58  }
  0x30   :  { %312 = vperm.xlu1 %2830, %v226_v45  }
  0x32   :  { %297 = vperm.xlu2 %2831, %v223_v59  }
  0x38   :  { %337 = vperm.xlu1 %2830, %v231_v48  }
  0x3a   :  { %262 = vperm.xlu2 %2831, %v216_v61  }
  0x42   :  { %267 = vperm.xlu2 %2831, %v217_v62  }
  0x4a   :  { %302 = vperm.xlu2 %2831, %v224_v0  }
  0x52   :  { %317 = vperm.xlu2 %2831, %v227_v1  }
  0x5a   :  { %327 = vperm.xlu2 %2831, %v229_v3  }
  0x62   :  { %347 = vperm.xlu2 %2831, %v233_v5  }
  0x86   :  { %v77_v14 = vpop.f32.mrf.mxu0 }
  0x87   :  { %v78_v15 = vadd.f32 %v3009_v13, %v77_v14 }
  0x89   :  { %151 = vxpose.xlu0.b32.start [1/4] (short) (narrow) %v78_v15, 64  ;;  %v2816_v15 = vld [vmem:[%s4050_s6 + $0x40] sm:$0xff] }
  0x8a   :  { %v129_v17 = vpop.f32.mrf.mxu1 }
  0x8b   :  { %v130_v18 = vadd.f32 %v3010_v16, %v129_v17 }
  0x8d   :  { %v142_v19 = vrot.slane %v130_v18, 4 }
  0x8e   :  { %v79_v20 = vpop.f32.mrf.mxu0 }
  0x8f   :  { %v80_v21 = vadd.f32 %v3009_v13, %v79_v20  ;;  %v278_v13 = vpop.permute.xlu2 %277 }
  0x91   :  { %v150_v22 = vsel %vm141_vm2, %v80_v21, %v142_v19 }
  0x92   :  { %v131_v23 = vpop.f32.mrf.mxu1  ;;  %152 = vxpose.xlu0.b32.cont [2/4] (short) (narrow) %v150_v22, 64 }
  0x93   :  { %v132_v24 = vadd.f32 %v3010_v16, %v131_v23  ;;  %v2817_v23 = vld [vmem:[%s4050_s6 + $0x48] sm:$0xff] }
  0x95   :  { %v143_v25 = vrot.slane %v132_v24, 4 }
  0x97   :  { %v144_v26 = vsel %vm141_vm2, %v142_v19, %v143_v25  ;;  %v283_v14 = vpop.permute.xlu2 %282 }
  0x9a   :  { %v134_v27 = vpop.f32.mrf.mxu1  ;;  %153 = vxpose.xlu0.b32.cont [3/4] (short) (narrow) %v144_v26, 64 }
  0x9b   :  { %v135_v28 = vadd.f32 %v3010_v16, %v134_v27  ;;  %v238_v16 = vpop.permute.xlu1 %237 }
  0x9d   :  { %v145_v29 = vrot.slane %v135_v28, 4 }
  0x9f   :  { %v146_v30 = vsel %vm141_vm2, %v143_v25, %v145_v29  ;;  %v253_v17 = vpop.permute.xlu2 %252 }
  0xa2   :  { %v136_v31 = vpop.f32.mrf.mxu1  ;;  %154 = vxpose.xlu0.b32.end [4/4] (short) (narrow) %v146_v30, 64 }
  0xa3   :  { %v243_v19 = vpop.permute.xlu1 %242 }
  0xa7   :  { %v258_v24 = vpop.permute.xlu2 %257 }
  0xab   :  { %v248_v28 = vpop.permute.xlu1 %247 }
  0xaf   :  { %v293_v27 = vpop.permute.xlu2 %292 }
  0xb3   :  { %v273_v45 = vpop.permute.xlu1 %272 }
  0xb7   :  { %v298_v34 = vpop.permute.xlu2 %297 }
  0xbb   :  { %v308_v3 = vpop.permute.xlu1 %307 }
  0xbf   :  { %v263_v37 = vpop.permute.xlu2 %262 }
  0xc7   :  { %v268_v43 = vpop.permute.xlu2 %267 }
 0x109   :  { %2832 = vset.pattern.permute.xlu0 %v3167_v35 }
 0x12e   :  { %v167_v32 = vpop.trf.xlu0 }
 0x130   :  { %287 = vperm.xlu0 %2832, %v221_v4  }
 0x136   :  { %v168_v33 = vpop.trf.xlu0 }
 0x137   :  { %v183_v53 = vpack.c.bf16 %v168_v33, %v167_v32  ;;  %v2818_v32 = vld [vmem:[%s4050_s6 + $0x50] sm:$0xff] }
 0x138   :  { %322 = vperm.xlu0 %2832, %v228_v7  }
 0x13e   :  { %v169_v36 = vpop.trf.xlu0 }
 0x140   :  { %332 = vperm.xlu0 %2832, %v230_v8  }
 0x146   :  { %v170_v38 = vpop.trf.xlu0 }
 0x147   :  { %v184_v51 = vpack.c.bf16 %v170_v38, %v169_v36 }
 0x148   :  { %342 = vperm.xlu0 %2832, %v232_v10   ;;  %v303_v10 = vpop.permute.xlu2 %302 }
 0x14e   :  { %v171_v40 = vpop.trf.xlu0 }
 0x150   :  { %352 = vperm.xlu0 %2832, %v234_v12  }
 0x156   :  { %v172_v42 = vpop.trf.xlu0 }
 0x157   :  { %v185_v50 = vpack.c.bf16 %v172_v42, %v171_v40  ;;  %v2819_v40 = vld [vmem:[%s4050_s6 + $0x58] sm:$0xff] }
 0x15e   :  { %v173_v44 = vpop.trf.xlu0 }
 0x166   :  { %v174_v46 = vpop.trf.xlu0 }
 0x167   :  { %v186_v47 = vpack.c.bf16 %v174_v46, %v173_v44 }
 0x169   :  { %456 = vmatpush.bf16.msra.mxu2 %v186_v47 }
 0x16d   :  { %457 = vmatpush.bf16.msra.mxu2 %v185_v50 }
 0x171   :  { %458 = vmatpush.bf16.msra.mxu2 %v184_v51 }
 0x175   :  { %459 = vmatpush.bf16.msra.mxu2 %v183_v53 }
 0x178   :  { %2721 = vmatmul.msk.bf16.vlgmr.msra.gmra.mxu2 %vm415_vm3, %v2808_v54 }
 0x188   :  { %2722 = vmatmul.msk.bf16.gmra.mxu2 %vm415_vm3, %v2809_v57 }
 0x198   :  { %2723 = vmatmul.msk.bf16.gmra.mxu2 %vm415_vm3, %v2810_v60 }
 0x1a8   :  { %2724 = vmatmul.msk.bf16.gmra.mxu2 %vm415_vm3, %v2811_v63 }
 0x1b8   :  { %2725 = vmatmul.msk.bf16.gmra.mxu2 %vm415_vm3, %v2812_v2 }
 0x1c8   :  { %2726 = vmatmul.msk.bf16.gmra.mxu2 %vm415_vm3, %v2813_v6 }
 0x1d8   :  { %2727 = vmatmul.msk.bf16.gmra.mxu2 %vm415_vm3, %v2814_v9  ;;  %v288_v9 = vpop.permute.xlu0 %287 }
 0x1e0   :  { %v323_v12 = vpop.permute.xlu0 %322 }
 0x1e8   :  { %2728 = vmatmul.msk.bf16.gmra.mxu2 %vm415_vm3, %v2815_v11 }
 0x1f8   :  { %2729 = vmatmul.msk.bf16.gmra.mxu2 %vm415_vm3, %v2816_v15 }
 0x1fb   :  { %v461_v18 = vpop.f32.mrf.mxu2 }
 0x1fc   :  { %v462_v21 = vadd.f32 %v461_v18, %v238_v16 }
 0x203   :  { %v463_v20 = vpop.f32.mrf.mxu2 }
 0x204   :  { %v464_v22 = vadd.f32 %v463_v20, %v243_v19 }
 0x206   :  { %v2833_v25 = vpack.i.bf16 %v464_v22, %v462_v21  ;;  %v313_v22 = vpop.permute.xlu1 %312 }
 0x208   :  { %2730 = vmatmul.msk.bf16.gmra.mxu2 %vm415_vm3, %v2817_v23  ;;  %2834 = vxpose.xlu1.b32.start.end [1/1] (short) (narrow) %v2833_v25, 32  ;;  %v333_v23 = vpop.permute.xlu0 %332 }
 0x20b   :  { %v466_v26 = vpop.f32.mrf.mxu2 }
 0x20c   :  { %v467_v30 = vadd.f32 %v466_v26, %v248_v28 }
 0x213   :  { %v468_v29 = vpop.f32.mrf.mxu2 }
 0x214   :  { %v469_v31 = vadd.f32 %v468_v29, %v253_v17  ;;  %v338_v29 = vpop.permute.xlu1 %337 }
 0x216   :  { %v2855_v33 = vpack.i.bf16 %v469_v31, %v467_v30 }
 0x218   :  { %2731 = vmatmul.msk.bf16.gmra.mxu2 %vm415_vm3, %v2818_v32  ;;  %2856 = vxpose.xlu2.b32.start.end [1/1] (short) (narrow) %v2855_v33, 32  ;;  %v343_v32 = vpop.permute.xlu0 %342 }
 0x21b   :  { %v471_v35 = vpop.f32.mrf.mxu2 }
 0x21c   :  { %v472_v36 = vadd.f32 %v471_v35, %v258_v24 }
 0x223   :  { %v473_v38 = vpop.f32.mrf.mxu2 }
 0x224   :  { %v474_v39 = vadd.f32 %v473_v38, %v263_v37 }
 0x226   :  { %v2877_v41 = vpack.i.bf16 %v474_v39, %v472_v36 }
 0x228   :  { %2732 = vmatmul.msk.bf16.gmra.mxu2 %vm415_vm3, %v2819_v40  ;;  %2878 = vxpose.xlu0.b32.start.end [1/1] (short) (narrow) %v2877_v41, 32 }
 0x22b   :  { %v476_v42 = vpop.f32.mrf.mxu2 }
 0x22c   :  { %v477_v44 = vadd.f32 %v476_v42, %v268_v43 }
 0x233   :  { %v478_v46 = vpop.f32.mrf.mxu2 }
 0x234   :  { %v479_v47 = vadd.f32 %v478_v46, %v273_v45 }
 0x236   :  { %v2899_v48 = vpack.i.bf16 %v479_v47, %v477_v44  ;;  %v353_v44 = vpop.permute.xlu0 %352 }
 0x238   :  { %2900 = vxpose.xlu1.b32.start.end [1/1] (short) (narrow) %v2899_v48, 32 }
 0x23b   :  { %v481_v49 = vpop.f32.mrf.mxu2 }
 0x23c   :  { %v482_v50 = vadd.f32 %v481_v49, %v278_v13  ;;  %v318_v13 = vpop.permute.xlu2 %317 }
 0x23e   :  { %v1065_v51 = vpack.c.bf16 %v482_v50, %v482_v50 }
 0x240   :  { %v1127_v52 = vsel %vm141_vm2, %v1065_v51, 0 }
 0x241   :  { %1136 = vmatpush.bf16.msra.mxu3 %v1127_v52 }
 0x243   :  { %v483_v53 = vpop.f32.mrf.mxu2 }
 0x244   :  { %v484_v54 = vadd.f32 %v483_v53, %v283_v14  ;;  %v328_v24 = vpop.permute.xlu2 %327 }
 0x246   :  { %v1066_v55 = vpack.c.bf16 %v484_v54, %v484_v54 }
 0x248   :  { %v1165_v56 = vsel %vm141_vm2, %v1066_v55, 0 }
 0x249   :  { %1174 = vmatpush.bf16.msrb.mxu0 %v1165_v56 }
 0x24b   :  { %v486_v57 = vpop.f32.mrf.mxu2 }
 0x24c   :  { %v487_v14 = vadd.f32 %v486_v57, %v288_v9  ;;  %v348_v36 = vpop.permute.xlu2 %347 }
 0x24e   :  { %v1067_v19 = vpack.c.bf16 %v487_v14, %v487_v14 }
 0x250   :  { %v1203_v21 = vsel %vm141_vm2, %v1067_v19, 0 }
 0x251   :  { %1212 = vmatpush.bf16.msrb.mxu3 %v1203_v21 }
 0x253   :  { %v488_v58 = vpop.f32.mrf.mxu2 }
 0x254   :  { %v489_v59 = vadd.f32 %v488_v58, %v293_v27 }
 0x256   :  { %v1068_v60 = vpack.c.bf16 %v489_v59, %v489_v59 }
 0x258   :  { %v1241_v61 = vsel %vm141_vm2, %v1068_v60, 0 }
 0x259   :  { %1250 = vmatpush.bf16.msrb.mxu1 %v1241_v61 }
 0x25b   :  { %v491_v62 = vpop.f32.mrf.mxu2 }
 0x25c   :  { %v492_v63 = vadd.f32 %v491_v62, %v298_v34 }
 0x25e   :  { %v1069_v0 = vpack.c.bf16 %v492_v63, %v492_v63 }
 0x260   :  { %v1279_v1 = vsel %vm141_vm2, %v1069_v0, 0 }
 0x261   :  { %1288 = vmatpush.bf16.msra.mxu0 %v1279_v1 }
 0x263   :  { %v493_v2 = vpop.f32.mrf.mxu2 }
 0x264   :  { %v494_v42 = vadd.f32 %v493_v2, %v303_v10 }
 0x266   :  { %v1070_v57 = vpack.c.bf16 %v494_v42, %v494_v42 }
 0x26b   :  { %v496_v4 = vpop.f32.mrf.mxu2 }
 0x26c   :  { %v497_v5 = vadd.f32 %v496_v4, %v308_v3 }
 0x26e   :  { %v1071_v6 = vpack.c.bf16 %v497_v5, %v497_v5 }
 0x270   :  { %v1355_v7 = vsel %vm141_vm2, %v1071_v6, 0 }
 0x271   :  { %1364 = vmatpush.bf16.msra.mxu1 %v1355_v7  ;;  %v1317_v7 = vsel %vm141_vm2, %v1070_v57, 0 }
 0x273   :  { %v498_v8 = vpop.f32.mrf.mxu2 }
 0x274   :  { %v499_v43 = vadd.f32 %v498_v8, %v313_v22 }
 0x276   :  { %v1072_v58 = vpack.c.bf16 %v499_v43, %v499_v43 }
 0x278   :  { %v1393_v8 = vsel %vm141_vm2, %v1072_v58, 0 }
 0x27b   :  { %v501_v11 = vpop.f32.mrf.mxu2 }
 0x27c   :  { %v502_v16 = vadd.f32 %v501_v11, %v318_v13 }
 0x283   :  { %v503_v15 = vpop.f32.mrf.mxu2 }
 0x284   :  { %v504_v17 = vadd.f32 %v503_v15, %v323_v12 }
 0x286   :  { %v2921_v18 = vpack.i.bf16 %v504_v17, %v502_v16 }
 0x288   :  { %2922 = vxpose.xlu1.b32.start.end [1/1] (short) (narrow) %v2921_v18, 32 }
 0x28b   :  { %v506_v20 = vpop.f32.mrf.mxu2 }
 0x28c   :  { %v3402_v26 = vadd.f32 %v506_v20, %v328_v24 }
 0x293   :  { %v508_v25 = vpop.f32.mrf.mxu2 }
 0x294   :  { %v3404_v27 = vadd.f32 %v508_v25, %v333_v23 }
 0x296   :  { %v2943_v28 = vpack.i.bf16 %v3402_v26, %v3404_v27 }
 0x29b   :  { %v511_v30 = vpop.f32.mrf.mxu2 }
 0x29c   :  { %v3408_v31 = vadd.f32 %v511_v30, %v338_v29 }
 0x2a3   :  { %v513_v33 = vpop.f32.mrf.mxu2 }
 0x2a4   :  { %v3410_v34 = vadd.f32 %v513_v33, %v343_v32 }
 0x2ab   :  { %v516_v37 = vpop.f32.mrf.mxu2 }
 0x2ac   :  { %v2835_v38 = vpop.trf.xlu1  ;;  %v3416_v45 = vadd.f32 %v516_v37, %v348_v36 }
 0x2ad   :  { %v2839_v39 = vunpack.i.h.bf16 %v2835_v38  ;;  %v2836_v40 = vunpack.i.l.bf16 %v2835_v38 }
 0x2af   :  { %v1037_v47 = vpack.c.bf16 %v2839_v39, %v2839_v39  ;;  %v1033_v48 = vpack.c.bf16 %v2836_v40, %v2836_v40 }
 0x2b1   :  { %v3414_v41 = vpop.trf.xlu2  ;;  %v1152_v60 = vunpack.c.l.b16 %v1037_v47  ;;  %v1113_v63 = vunpack.c.l.b16 %v1033_v48 }
 0x2b2   :  { %v2861_v49 = vunpack.i.h.bf16 %v3414_v41  ;;  %v2858_v37 = vunpack.i.l.bf16 %v3414_v41 }
 0x2b3   :  { %v518_v46 = vpop.f32.mrf.mxu2 }
 0x2b4   :  { %v3419_v50 = vadd.f32 %v518_v46, %v353_v44  ;;  %v2840_v51 = vpop.trf.xlu1  ;;  %v1045_v59 = vpack.c.bf16 %v2861_v49, %v2861_v49  ;;  %v1041_v46 = vpack.c.bf16 %v2858_v37, %v2858_v37 }
 0x2b5   :  { %v2844_v52 = vunpack.i.h.bf16 %v2840_v51  ;;  %v2841_v53 = vunpack.i.l.bf16 %v2840_v51 }
 0x2b6   :  { %v2987_v54 = vpack.i.bf16 %v3419_v50, %v3416_v45  ;;  %v1228_v4 = vunpack.c.l.b16 %v1045_v59  ;;  %v1190_v51 = vunpack.c.l.b16 %v1041_v46 }
 0x2b7   :  { %v1038_v55 = vpack.c.bf16 %v2844_v52, %v2844_v52  ;;  %v1034_v56 = vpack.c.bf16 %v2841_v53, %v2841_v53 }
 0x2b9   :  { %v1153_v61 = vunpack.c.l.b16 %v1038_v55  ;;  %v2862_v62 = vpop.trf.xlu2  ;;  %v1114_v0 = vunpack.c.l.b16 %v1034_v56 }
 0x2ba   :  { %v2866_v1 = vunpack.i.h.bf16 %v2862_v62  ;;  %v2863_v42 = vunpack.i.l.bf16 %v2862_v62 }
 0x2bb   :  { %v1117_v2 = vpack.c.b16 %v1114_v0, %v1113_v63  ;;  %v1156_v3 = vpack.c.b16 %v1153_v61, %v1152_v60 }
 0x2bc   :  { %v1046_v5 = vpack.c.bf16 %v2866_v1, %v2866_v1  ;;  %v2845_v6 = vpop.trf.xlu1  ;;  %v1042_v48 = vpack.c.bf16 %v2863_v42, %v2863_v42 }
 0x2bd   :  { %2733 = vmatmul.msk.bf16.vlgmr.msra.gmra.mxu3 %vm1119_vm4, %v1117_v2  ;;  %2735 = vmatmul.msk.bf16.vlgmr.msrb.gmra.mxu0 %vm1119_vm4, %v1156_v3  ;;  %v2849_v10 = vunpack.i.h.bf16 %v2845_v6  ;;  %v2846_v11 = vunpack.i.l.bf16 %v2845_v6 }
 0x2be   :  { %v1229_v9 = vunpack.c.l.b16 %v1046_v5  ;;  %1326 = vmatpush.bf16.msra.mxu3 %v1317_v7  ;;  %1402 = vmatpush.bf16.msrb.mxu0 %v1393_v8  ;;  %v1191_v53 = vunpack.c.l.b16 %v1042_v48 }
 0x2bf   :  { %v1039_v14 = vpack.c.bf16 %v2849_v10, %v2849_v10  ;;  %v1035_v15 = vpack.c.bf16 %v2846_v11, %v2846_v11 }
 0x2c0   :  { %v1232_v12 = vpack.c.b16 %v1229_v9, %v1228_v4  ;;  %v1194_v58 = vpack.c.b16 %v1191_v53, %v1190_v51 }
 0x2c1   :  { %v2867_v13 = vpop.trf.xlu2  ;;  %v1115_v22 = vunpack.c.l.b16 %v1035_v15  ;;  %v1154_v23 = vunpack.c.l.b16 %v1039_v14 }
 0x2c2   :  { %2739 = vmatmul.msk.bf16.vlgmr.msrb.gmra.mxu1 %vm1119_vm4, %v1232_v12  ;;  %v2871_v17 = vunpack.i.h.bf16 %v2867_v13  ;;  %v2868_v60 = vunpack.i.l.bf16 %v2867_v13 }
 0x2c4   :  { %v2850_v16 = vpop.trf.xlu1  ;;  %v1047_v24 = vpack.c.bf16 %v2871_v17, %v2871_v17  ;;  %v1043_v1 = vpack.c.bf16 %v2868_v60, %v2868_v60 }
 0x2c5   :  { %v2854_v18 = vunpack.i.h.bf16 %v2850_v16  ;;  %v2851_v19 = vunpack.i.l.bf16 %v2850_v16 }
 0x2c6   :  { %v1230_v40 = vunpack.c.l.b16 %v1047_v24  ;;  %v1192_v8 = vunpack.c.l.b16 %v1043_v1 }
 0x2c7   :  { %v1040_v20 = vpack.c.bf16 %v2854_v18, %v2854_v18  ;;  %v1036_v21 = vpack.c.bf16 %v2851_v19, %v2851_v19 }
 0x2c9   :  { %v1116_v25 = vunpack.c.l.b16 %v1036_v21  ;;  %v1155_v29 = vunpack.c.l.b16 %v1040_v20  ;;  %v2872_v30 = vpop.trf.xlu2 }
 0x2ca   :  { %v2876_v32 = vunpack.i.h.bf16 %v2872_v30  ;;  %v2873_v63 = vunpack.i.l.bf16 %v2872_v30 }
 0x2cb   :  { %v1118_v33 = vpack.c.b16 %v1116_v25, %v1115_v22  ;;  %v1157_v36 = vpack.c.b16 %v1155_v29, %v1154_v23 }
 0x2cc   :  { %v2879_v38 = vpop.trf.xlu0  ;;  %v1048_v39 = vpack.c.bf16 %v2876_v32, %v2876_v32  ;;  %v1044_v3 = vpack.c.bf16 %v2873_v63, %v2873_v63 }
 0x2cd   :  { %2734 = vmatmul.msk.bf16.gmra.mxu3 %vm1119_vm4, %v1118_v33  ;;  %2736 = vmatmul.msk.bf16.gmra.mxu0 %vm1119_vm4, %v1157_v36  ;;  %v2880_v44 = vunpack.i.l.bf16 %v2879_v38  ;;  %v2883_v20 = vunpack.i.h.bf16 %v2879_v38 }
 0x2ce   :  { %v1231_v43 = vunpack.c.l.b16 %v1048_v39  ;;  %v1193_v10 = vunpack.c.l.b16 %v1044_v3 }
 0x2cf   :  { %v1049_v49 = vpack.c.bf16 %v2880_v44, %v2880_v44  ;;  %v1053_v30 = vpack.c.bf16 %v2883_v20, %v2883_v20 }
 0x2d0   :  { %v1233_v47 = vpack.c.b16 %v1231_v43, %v1230_v40  ;;  %v1195_v16 = vpack.c.b16 %v1193_v10, %v1192_v8 }
 0x2d1   :  { %v1266_v55 = vunpack.c.l.b16 %v1049_v49  ;;  %v1304_v39 = vunpack.c.l.b16 %v1053_v30 }
 0x2d2   :  { %2740 = vmatmul.msk.bf16.gmra.mxu1 %vm1119_vm4, %v1233_v47 }
 0x2d4   :  { %v2884_v52 = vpop.trf.xlu0 }
 0x2d5   :  { %v2885_v41 = vunpack.i.l.bf16 %v2884_v52  ;;  %v2888_v21 = vunpack.i.h.bf16 %v2884_v52 }
 0x2d7   :  { %v1050_v56 = vpack.c.bf16 %v2885_v41, %v2885_v41  ;;  %v1054_v32 = vpack.c.bf16 %v2888_v21, %v2888_v21 }
 0x2d9   :  { %v1267_v57 = vunpack.c.l.b16 %v1050_v56  ;;  %v1305_v40 = vunpack.c.l.b16 %v1054_v32 }
 0x2db   :  { %v1270_v59 = vpack.c.b16 %v1267_v57, %v1266_v55  ;;  %v1308_v48 = vpack.c.b16 %v1305_v40, %v1304_v39 }
 0x2dc   :  { %v2889_v61 = vpop.trf.xlu0  ;;  %v2901_v62 = vpop.trf.xlu1 }
 0x2dd   :  { %2737 = vmatmul.msk.bf16.vlgmr.msrb.gmra.mxu3 %vm1119_vm4, %v1194_v58  ;;  %2741 = vmatmul.msk.bf16.vlgmr.msra.gmra.mxu0 %vm1119_vm4, %v1270_v59  ;;  %v2890_v0 = vunpack.i.l.bf16 %v2889_v61  ;;  %v2902_v2 = vunpack.i.l.bf16 %v2901_v62  ;;  %v2905_v22 = vunpack.i.h.bf16 %v2901_v62  ;;  %v2893_v53 = vunpack.i.h.bf16 %v2889_v61  ;;  %v3445_v61 = vld [vmem:[%s4049_s5] sm:$0xff] }
 0x2df   :  { %v1051_v4 = vpack.c.bf16 %v2890_v0, %v2890_v0  ;;  %v1057_v5 = vpack.c.bf16 %v2902_v2, %v2902_v2  ;;  %v1061_v33 = vpack.c.bf16 %v2905_v22, %v2905_v22  ;;  %v1055_v57 = vpack.c.bf16 %v2893_v53, %v2893_v53  ;;  %v3478_v22 = vld [vmem:[%s4049_s5 + $0x10] sm:$0xff]  ;;  %v3515_v53 = vld [vmem:[%s4049_s5 + $0x18] sm:$0xff] }
 0x2e1   :  { %v1268_v13 = vunpack.c.l.b16 %v1051_v4  ;;  %v1342_v14 = vunpack.c.l.b16 %v1057_v5  ;;  %v1380_v38 = vunpack.c.l.b16 %v1061_v33  ;;  %v1306_v62 = vunpack.c.l.b16 %v1055_v57 }
 0x2e4   :  { %v2894_v6 = vpop.trf.xlu0  ;;  %v2906_v7 = vpop.trf.xlu1 }
 0x2e5   :  { %v2895_v9 = vunpack.i.l.bf16 %v2894_v6  ;;  %v2907_v11 = vunpack.i.l.bf16 %v2906_v7  ;;  %v2910_v25 = vunpack.i.h.bf16 %v2906_v7  ;;  %v2898_v41 = vunpack.i.h.bf16 %v2894_v6 }
 0x2e7   :  { %v1052_v12 = vpack.c.bf16 %v2895_v9, %v2895_v9  ;;  %v1058_v15 = vpack.c.bf16 %v2907_v11, %v2907_v11  ;;  %v1062_v36 = vpack.c.bf16 %v2910_v25, %v2910_v25  ;;  %v1056_v58 = vpack.c.bf16 %v2898_v41, %v2898_v41 }
 0x2e9   :  { %v1269_v17 = vunpack.c.l.b16 %v1052_v12  ;;  %v1343_v18 = vunpack.c.l.b16 %v1058_v15  ;;  %v1381_v43 = vunpack.c.l.b16 %v1062_v36  ;;  %v1307_v63 = vunpack.c.l.b16 %v1056_v58  ;;  %v3460_v12 = vld [vmem:[%s4049_s5 + $0x8] sm:$0xff] }
 0x2eb   :  { %v1271_v19 = vpack.c.b16 %v1269_v17, %v1268_v13  ;;  %v1346_v23 = vpack.c.b16 %v1343_v18, %v1342_v14  ;;  %v1384_v49 = vpack.c.b16 %v1381_v43, %v1380_v38  ;;  %v1309_v2 = vpack.c.b16 %v1307_v63, %v1306_v62 }
 0x2ec   :  { %v2911_v24 = vpop.trf.xlu1 }
 0x2ed   :  { %2738 = vmatmul.msk.bf16.gmra.mxu3 %vm1119_vm4, %v1195_v16  ;;  %2742 = vmatmul.msk.bf16.gmra.mxu0 %vm1119_vm4, %v1271_v19  ;;  %v2912_v29 = vunpack.i.l.bf16 %v2911_v24  ;;  %v2915_v55 = vunpack.i.h.bf16 %v2911_v24 }
 0x2ee   :  { %2745 = vmatmul.msk.bf16.vlgmr.msra.gmra.mxu1 %vm1119_vm4, %v1346_v23 }
 0x2ef   :  { %v1059_v37 = vpack.c.bf16 %v2912_v29, %v2912_v29  ;;  %v1063_v59 = vpack.c.bf16 %v2915_v55, %v2915_v55 }
 0x2f1   :  { %v1344_v47 = vunpack.c.l.b16 %v1059_v37  ;;  %v1382_v0 = vunpack.c.l.b16 %v1063_v59 }
 0x2f4   :  { %v2916_v42 = vpop.trf.xlu1 }
 0x2f5   :  { %v2917_v44 = vunpack.i.l.bf16 %v2916_v42  ;;  %v2920_v56 = vunpack.i.h.bf16 %v2916_v42 }
 0x2f7   :  { %v1060_v46 = vpack.c.bf16 %v2917_v44, %v2917_v44  ;;  %v1064_v60 = vpack.c.bf16 %v2920_v56, %v2920_v56 }
 0x2f9   :  { %v1345_v51 = vunpack.c.l.b16 %v1060_v46  ;;  %v1383_v1 = vunpack.c.l.b16 %v1064_v60 }
 0x2fb   :  { %v1347_v52 = vpack.c.b16 %v1345_v51, %v1344_v47  ;;  %v1385_v3 = vpack.c.b16 %v1383_v1, %v1382_v0 }
 0x2fd   :  { %2743 = vmatmul.msk.bf16.vlgmr.msra.gmra.mxu3 %vm1119_vm4, %v1308_v48  ;;  %2747 = vmatmul.msk.bf16.vlgmr.msrb.gmra.mxu0 %vm1119_vm4, %v1384_v49 }
 0x2fe   :  { %2746 = vmatmul.msk.bf16.gmra.mxu1 %vm1119_vm4, %v1347_v52 }
 0x30d   :  { %2744 = vmatmul.msk.bf16.gmra.mxu3 %vm1119_vm4, %v1309_v2  ;;  %2748 = vmatmul.msk.bf16.gmra.mxu0 %vm1119_vm4, %v1385_v3 }
 0x32c   :  { %v3522_v57 = vpop.trf.xlu1 }
 0x33a   :  { %v1176_v4 = vpop.f32.mrf.mxu0 }
 0x33b   :  { %v3448_v5 = vadd.f32 %v1176_v4, %v3445_v61 }
 0x33d   :  { %v1426_v6 = vsel %vm64_vm0, %v3448_v5, -inf }
 0x33e   :  { %1427 = vmax.xlane.f32.xlu1 %v1426_v6  ;;  %v3542_v6 = vpop.trf.xlu1 }
 0x33f   :  { %v1252_v7 = vpop.f32.mrf.mxu1 }
 0x340   :  { %v1138_v8 = vpop.f32.mrf.mxu3  ;;  %v3508_v49 = vadd.f32 %v1252_v7, %v3445_v61 }
 0x341   :  { %v3453_v9 = vadd.f32 %v1138_v8, %v3445_v61 }
 0x342   :  { %v1178_v10 = vpop.f32.mrf.mxu0  ;;  %v1450_v52 = vsel %vm64_vm0, %v3508_v49, -inf }
 0x343   :  { %v1414_v11 = vsel %vm64_vm0, %v3453_v9, -inf  ;;  %v3473_v20 = vadd.f32 %v1178_v10, %v3460_v12 }
 0x344   :  { %1415 = vmax.xlane.f32.xlu0 %v1414_v11 }
 0x345   :  { %v1429_v24 = vsel %vm64_vm0, %v3473_v20, -inf }
 0x347   :  { %v1254_v13 = vpop.f32.mrf.mxu1 }
 0x348   :  { %v1140_v14 = vpop.f32.mrf.mxu3  ;;  %v3463_v15 = vadd.f32 %v1254_v13, %v3460_v12 }
 0x349   :  { %v3466_v16 = vadd.f32 %v1140_v14, %v3460_v12 }
 0x34a   :  { %v1181_v17 = vpop.f32.mrf.mxu0  ;;  %v1453_v18 = vsel %vm64_vm0, %v3463_v15, -inf }
 0x34b   :  { %v1417_v19 = vsel %vm64_vm0, %v3466_v16, -inf  ;;  %v3491_v37 = vadd.f32 %v1181_v17, %v3478_v22 }
 0x34c   :  { %1418 = vmax.xlane.f32.xlu2 %v1417_v19  ;;  %1454 = vmax.xlane.f32.xlu0 %v1453_v18  ;;  %v3556_v18 = vpop.trf.xlu1 }
 0x34d   :  { %v1432_v43 = vsel %vm64_vm0, %v3491_v37, -inf }
 0x34f   :  { %v1257_v29 = vpop.f32.mrf.mxu1 }
 0x350   :  { %v1143_v21 = vpop.f32.mrf.mxu3  ;;  %v3496_v40 = vadd.f32 %v1257_v29, %v3478_v22 }
 0x351   :  { %v3483_v25 = vadd.f32 %v1143_v21, %v3478_v22 }
 0x352   :  { %v1183_v23 = vpop.f32.mrf.mxu0  ;;  %v1456_v48 = vsel %vm64_vm0, %v3496_v40, -inf }
 0x353   :  { %v1420_v32 = vsel %vm64_vm0, %v3483_v25, -inf  ;;  %v3535_v2 = vadd.f32 %v1183_v23, %v3515_v53 }
 0x354   :  { %1430 = vmax.xlane.f32.xlu2 %v1429_v24 }
 0x355   :  { %v1435_v10 = vsel %vm64_vm0, %v3535_v2, -inf }
 0x357   :  { %v1259_v44 = vpop.f32.mrf.mxu1 }
 0x358   :  { %v1145_v30 = vpop.f32.mrf.mxu3 }
 0x359   :  { %v3520_v56 = vadd.f32 %v1145_v30, %v3515_v53 }
 0x35a   :  { %v1290_v33 = vpop.f32.mrf.mxu0 }
 0x35b   :  { %v3488_v36 = vadd.f32 %v1290_v33, %v3445_v61  ;;  %v1423_v60 = vsel %vm64_vm0, %v3520_v56, -inf  ;;  %v3568_v33 = vpop.trf.xlu1 }
 0x35c   :  { %1421 = vmax.xlane.f32.xlu2 %v1420_v32 }
 0x35d   :  { %v1462_v39 = vsel %vm64_vm0, %v3488_v36, -inf }
 0x35e   :  { %1463 = vmax.xlane.f32.xlu1 %v1462_v39 }
 0x360   :  { %v1214_v38 = vpop.f32.mrf.mxu3 }
 0x361   :  { %v3499_v42 = vadd.f32 %v1214_v38, %v3445_v61 }
 0x362   :  { %v1292_v46 = vpop.f32.mrf.mxu0 }
 0x363   :  { %v1438_v47 = vsel %vm64_vm0, %v3499_v42, -inf  ;;  %v3566_v32 = vadd.f32 %v1292_v46, %v3460_v12 }
 0x364   :  { %1433 = vmax.xlane.f32.xlu2 %v1432_v43  ;;  %1439 = vmax.xlane.f32.xlu0 %v1438_v47 }
 0x365   :  { %v1465_v43 = vsel %vm64_vm0, %v3566_v32, -inf }
 0x366   :  { %1457 = vmax.xlane.f32.xlu1 %v1456_v48 }
 0x368   :  { %v1216_v51 = vpop.f32.mrf.mxu3 }
 0x369   :  { %v3554_v17 = vadd.f32 %v1216_v51, %v3460_v12  ;;  %v3578_v51 = vadd.f32 %v1259_v44, %v3515_v53 }
 0x36a   :  { %v1295_v41 = vpop.f32.mrf.mxu0 }
 0x36b   :  { %v3517_v55 = vpop.f32.mrf.mxu1  ;;  %v3538_v3 = vadd.f32 %v1295_v41, %v3478_v22  ;;  %v1441_v23 = vsel %vm64_vm0, %v3554_v17, -inf  ;;  %v1459_v41 = vsel %vm64_vm0, %v3578_v51, -inf }
 0x36c   :  { %1451 = vmax.xlane.f32.xlu2 %v1450_v52 }
 0x36d   :  { %v1468_v11 = vsel %vm64_vm0, %v3538_v3, -inf }
 0x370   :  { %v1219_v58 = vpop.f32.mrf.mxu3 }
 0x371   :  { %v3525_v59 = vadd.f32 %v1219_v58, %v3478_v22 }
 0x372   :  { %v1297_v62 = vpop.f32.mrf.mxu0 }
 0x373   :  { %v3530_v63 = vadd.f32 %v1297_v62, %v3515_v53  ;;  %v1444_v0 = vsel %vm64_vm0, %v3525_v59, -inf  ;;  %v1368_v1 = vpop.f32.mrf.mxu1 }
 0x374   :  { %1424 = vmax.xlane.f32.xlu2 %v1423_v60  ;;  %1445 = vmax.xlane.f32.xlu1 %v1444_v0  ;;  %v3545_v7 = vadd.f32 %v1368_v1, %v3460_v12 }
 0x375   :  { %v1471_v4 = vsel %vm64_vm0, %v3530_v63, -inf }
 0x376   :  { %1472 = vmax.xlane.f32.xlu0 %v1471_v4  ;;  %v1489_v14 = vsel %vm64_vm0, %v3545_v7, -inf }
 0x378   :  { %v1221_v8 = vpop.f32.mrf.mxu3 }
 0x379   :  { %v3588_v62 = vadd.f32 %v1221_v8, %v3515_v53 }
 0x37a   :  { %v1404_v13 = vpop.f32.mrf.mxu0 }
 0x37b   :  { %v1371_v24 = vpop.f32.mrf.mxu1  ;;  %v1447_v1 = vsel %vm64_vm0, %v3588_v62, -inf }
 0x37c   :  { %1436 = vmax.xlane.f32.xlu2 %v1435_v10  ;;  %1469 = vmax.xlane.f32.xlu1 %v1468_v11  ;;  %v3598_v11 = vadd.f32 %v1404_v13, %v3445_v61 }
 0x37e   :  { %1490 = vmax.xlane.f32.xlu0 %v1489_v14  ;;  %v1498_v14 = vsel %vm64_vm0, %v3598_v11, -inf }
 0x380   :  { %v1328_v19 = vpop.f32.mrf.mxu3 }
 0x381   :  { %v3559_v21 = vadd.f32 %v1328_v19, %v3445_v61 }
 0x382   :  { %v1406_v30 = vpop.f32.mrf.mxu0 }
 0x383   :  { %v1474_v29 = vsel %vm64_vm0, %v3559_v21, -inf  ;;  %v3571_v39 = vadd.f32 %v1406_v30, %v3460_v12  ;;  %v1373_v48 = vpop.f32.mrf.mxu1 }
 0x384   :  { %1442 = vmax.xlane.f32.xlu2 %v1441_v23  ;;  %v3581_v46 = vadd.f32 %v1373_v48, %v3515_v53  ;;  %v3608_v23 = vadd.f32 %v1371_v24, %v3478_v22 }
 0x385   :  { %v1501_v47 = vsel %vm64_vm0, %v3571_v39, -inf }
 0x386   :  { %1475 = vmax.xlane.f32.xlu0 %v1474_v29  ;;  %v1495_v60 = vsel %vm64_vm0, %v3581_v46, -inf  ;;  %v1492_v29 = vsel %vm64_vm0, %v3608_v23, -inf }
 0x388   :  { %v1330_v38 = vpop.f32.mrf.mxu3 }
 0x389   :  { %v3613_v13 = vadd.f32 %v1330_v38, %v3460_v12 }
 0x38a   :  { %v1409_v58 = vpop.f32.mrf.mxu0 }
 0x38b   :  { %v3625_v12 = vadd.f32 %v1409_v58, %v3478_v22 }
 0x38c   :  { %1466 = vmax.xlane.f32.xlu2 %v1465_v43 }
 0x38d   :  { %4064 = vst [vmem:[#allocation5_spill] sm:$0xff] %v3625_v12 }
 0x38e   :  { %1502 = vmax.xlane.f32.xlu0 %v1501_v47 }
 0x390   :  { %v1333_v52 = vpop.f32.mrf.mxu3 }
 0x391   :  { %v3618_v30 = vadd.f32 %v1333_v52, %v3478_v22  ;;  %v1504_v52 = vsel %vm64_vm0, %v3625_v12, -inf }
 0x392   :  { %v1411_v10 = vpop.f32.mrf.mxu0 }
 0x393   :  { %v3601_v8 = vadd.f32 %v1411_v10, %v3515_v53  ;;  %v1480_v48 = vsel %vm64_vm0, %v3618_v30, -inf }
 0x394   :  { %1460 = vmax.xlane.f32.xlu2 %v1459_v41 }
 0x395   :  { %v1507_v19 = vsel %vm64_vm0, %v3601_v8, -inf }
 0x396   :  { %1496 = vmax.xlane.f32.xlu0 %v1495_v60 }
 0x398   :  { %v1335_v0 = vpop.f32.mrf.mxu3 }
 0x399   :  { %v3591_v44 = vadd.f32 %v1335_v0, %v3515_v53  ;;  %v1477_v53 = vsel %vm64_vm0, %v3613_v13, -inf }
 0x39b   :  { %v1483_v4 = vsel %vm64_vm0, %v3591_v44, -inf }
 0x39c   :  { %1448 = vmax.xlane.f32.xlu2 %v1447_v1 }
 0x39e   :  { %1484 = vmax.xlane.f32.xlu0 %v1483_v4 }
 0x3a4   :  { %1499 = vmax.xlane.f32.xlu2 %v1498_v14 }
 0x3a6   :  { %1508 = vmax.xlane.f32.xlu0 %v1507_v19 }
 0x3ac   :  { %1493 = vmax.xlane.f32.xlu2 %v1492_v29  ;;  %v2934_v29 = vunpack.i.l.bf16 %v3556_v18 }
 0x3b1   :  { %v1428_v43 = vpop.xlane.xlu1 %1427 }
 0x3b2   :  { %v1514_v41 = vsub.f32 %v3448_v5, %v1428_v43  ;;  %v2939_v43 = vunpack.i.l.bf16 %v3568_v33 }
 0x3b4   :  { %1478 = vmax.xlane.f32.xlu2 %v1477_v53  ;;  %v1550_v38 = vmul.f32 1.442695, %v1514_v41  ;;  %v2942_v53 = vunpack.i.h.bf16 %v3568_v33  ;;  %v2927_v33 = vunpack.i.h.bf16 %v3522_v57 }
 0x3b7   :  { %v1416_v47 = vpop.xlane.xlu0 %1415 }
 0x3b8   :  { %v1510_v24 = vsub.f32 %v3453_v9, %v1416_v47 }
 0x3ba   :  { %v1542_v60 = vmul.f32 1.442695, %v1510_v24 }
 0x3bc   :  { %3013 = vpow2.f32 %v1542_v60  ;;  %1481 = vmax.xlane.f32.xlu2 %v1480_v48  ;;  %v1075_v60 = vpack.c.bf16 %v2934_v29, %v2934_v29 }
 0x3bd   :  { %3015 = vpow2.f32 %v1550_v38 }
 0x3bf   :  { %v1419_v0 = vpop.xlane.xlu2 %1418 }
 0x3c0   :  { %v1511_v9 = vsub.f32 %v3466_v16, %v1419_v0  ;;  %v2937_v16 = vunpack.i.h.bf16 %v3556_v18  ;;  %v1080_v0 = vpack.c.bf16 %v2942_v53, %v2942_v53 }
 0x3c2   :  { %v3629_v1 = vpop.eup %3013  ;;  %v1544_v5 = vmul.f32 1.442695, %v1511_v9  ;;  %v1079_v41 = vpack.c.bf16 %v2937_v16, %v2937_v16  ;;  %v1455_v16 = vpop.xlane.xlu0 %1454 }
 0x3c3   :  { %v1606_v4 = vsel %vm64_vm0, %v3629_v1, 0.0  ;;  %v3634_v14 = vpop.eup %3015 }
 0x3c4   :  { %1505 = vmax.xlane.f32.xlu2 %v1504_v52  ;;  %1607 = vadd.xlane.f32.xlu1 %v1606_v4  ;;  %3017 = vpow2.f32 %v1544_v5  ;;  %v1618_v19 = vsel %vm64_vm0, %v3634_v14, 0.0  ;;  %v1076_v52 = vpack.c.bf16 %v2939_v43, %v2939_v43  ;;  %v2929_v4 = vunpack.i.l.bf16 %v3542_v6 }
 0x3c5   :  { %v2932_v5 = vunpack.i.h.bf16 %v3542_v6  ;;  %v1077_v43 = vpack.c.bf16 %v2927_v33, %v2927_v33 }
 0x3c7   :  { %v1431_v10 = vpop.xlane.xlu2 %1430 }
 0x3c8   :  { %v1515_v22 = vsub.f32 %v3473_v20, %v1431_v10  ;;  %v1861_v10 = vunpack.c.l.b16 %v1079_v41 }
 0x3ca   :  { %v1552_v58 = vmul.f32 1.442695, %v1515_v22  ;;  %v3643_v24 = vpop.eup %3017  ;;  %v1814_v22 = vunpack.c.l.b16 %v1075_v60 }
 0x3cb   :  { %v1609_v9 = vsel %vm64_vm0, %v3643_v24, 0.0 }
 0x3cc   :  { %3019 = vpow2.f32 %v1552_v58  ;;  %1619 = vadd.xlane.f32.xlu2 %v1618_v19  ;;  %v1862_v58 = vunpack.c.l.b16 %v1080_v0  ;;  %v1815_v19 = vunpack.c.l.b16 %v1076_v52  ;;  %v1859_v0 = vunpack.c.l.b16 %v1077_v43 }
 0x3ce   :  { %v1817_v35 = vpack.c.b16 %v1815_v19, %v1814_v22  ;;  %v1864_v6 = vpack.c.b16 %v1862_v58, %v1861_v10 }
 0x3cf   :  { %v1422_v47 = vpop.xlane.xlu2 %1421 }
 0x3d0   :  { %v1512_v20 = vsub.f32 %v3483_v25, %v1422_v47  ;;  %v2924_v25 = vunpack.i.l.bf16 %v3522_v57  ;;  %1832 = vmatpush.bf16.msrb.mxu3 %v1817_v35  ;;  %1879 = vmatpush.bf16.msrb.mxu1 %v1864_v6 }
 0x3d2   :  { %v3646_v48 = vpop.eup %3019  ;;  %v1546_v38 = vmul.f32 1.442695, %v1512_v20  ;;  %v1073_v47 = vpack.c.bf16 %v2924_v25, %v2924_v25  ;;  %v1074_v20 = vpack.c.bf16 %v2929_v4, %v2929_v4 }
 0x3d3   :  { %v1621_v18 = vsel %vm64_vm0, %v3646_v48, 0.0 }
 0x3d4   :  { %3021 = vpow2.f32 %v1546_v38  ;;  %1610 = vadd.xlane.f32.xlu2 %v1609_v9  ;;  %1622 = vadd.xlane.f32.xlu1 %v1621_v18  ;;  %v1078_v9 = vpack.c.bf16 %v2932_v5, %v2932_v5  ;;  %v1812_v41 = vunpack.c.l.b16 %v1073_v47  ;;  %v1813_v60 = vunpack.c.l.b16 %v1074_v20 }
 0x3d6   :  { %v1816_v25 = vpack.c.b16 %v1813_v60, %v1812_v41 }
 0x3d7   :  { %v1434_v29 = vpop.xlane.xlu2 %1433  ;;  %v1440_v52 = vpop.xlane.xlu0 %1439 }
 0x3d8   :  { %v1516_v53 = vsub.f32 %v3491_v37, %v1434_v29  ;;  %v1860_v37 = vunpack.c.l.b16 %v1078_v9  ;;  %1833 = vmatpush.bf16.msrb.mxu3 %v1816_v25  ;;  %v1518_v22 = vsub.f32 %v3499_v42, %v1440_v52  ;;  %v3672_v42 = vpop.xlane.xlu1 %1463 }
 0x3da   :  { %v3657_v38 = vpop.eup %3021  ;;  %v1554_v18 = vmul.f32 1.442695, %v1516_v53  ;;  %v1863_v5 = vpack.c.b16 %v1860_v37, %v1859_v0  ;;  %v1558_v58 = vmul.f32 1.442695, %v1518_v22 }
 0x3db   :  { %v1612_v57 = vsel %vm64_vm0, %v3657_v38, 0.0 }
 0x3dc   :  { %3023 = vpow2.f32 %v1554_v18  ;;  %1613 = vadd.xlane.f32.xlu2 %v1612_v57  ;;  %1880 = vmatpush.bf16.msrb.mxu1 %v1863_v5 }
 0x3df   :  { %v1452_v33 = vpop.xlane.xlu2 %1451 }
 0x3e0   :  { %v1522_v4 = vsub.f32 %v3508_v49, %v1452_v33  ;;  %v1458_v37 = vpop.xlane.xlu1 %1457 }
 0x3e2   :  { %v3662_v29 = vpop.eup %3023  ;;  %v1566_v10 = vmul.f32 1.442695, %v1522_v4 }
 0x3e3   :  { %v1624_v35 = vsel %vm64_vm0, %v3662_v29, 0.0 }
 0x3e4   :  { %3025 = vpow2.f32 %v1566_v10  ;;  %1625 = vadd.xlane.f32.xlu2 %v1624_v35 }
 0x3e5   :  { %3027 = vpow2.f32 %v1558_v58 }
 0x3e7   :  { %v1425_v19 = vpop.xlane.xlu2 %1424 }
 0x3e8   :  { %v1513_v53 = vsub.f32 %v3520_v56, %v1425_v19  ;;  %v1523_v56 = vsub.f32 %v3463_v15, %v1455_v16 }
 0x3ea   :  { %v3668_v43 = vpop.eup %3025  ;;  %v1548_v49 = vmul.f32 1.442695, %v1513_v53  ;;  %v1568_v0 = vmul.f32 1.442695, %v1523_v56 }
 0x3eb   :  { %v1642_v47 = vsel %vm64_vm0, %v3668_v43, 0.0  ;;  %v3674_v9 = vpop.eup %3027 }
 0x3ec   :  { %3029 = vpow2.f32 %v1548_v49  ;;  %1643 = vadd.xlane.f32.xlu2 %v1642_v47  ;;  %v1630_v60 = vsel %vm64_vm0, %v3674_v9, 0.0 }
 0x3ef   :  { %v1437_v20 = vpop.xlane.xlu2 %1436 }
 0x3f0   :  { %v1517_v18 = vsub.f32 %v3535_v2, %v1437_v20  ;;  %v1524_v2 = vsub.f32 %v3496_v40, %v1458_v37  ;;  %v1446_v40 = vpop.xlane.xlu1 %1445 }
 0x3f2   :  { %v3677_v57 = vpop.eup %3029  ;;  %v1556_v6 = vmul.f32 1.442695, %v1517_v18  ;;  %v1570_v16 = vmul.f32 1.442695, %v1524_v2 }
 0x3f3   :  { %v1615_v41 = vsel %vm64_vm0, %v3677_v57, 0.0 }
 0x3f4   :  { %3031 = vpow2.f32 %v1556_v6  ;;  %1616 = vadd.xlane.f32.xlu0 %v1615_v41  ;;  %1631 = vadd.xlane.f32.xlu2 %v1630_v60 }
 0x3f5   :  { %3033 = vpow2.f32 %v1568_v0 }
 0x3f6   :  { %3035 = vpow2.f32 %v1570_v16 }
 0x3f7   :  { %v1443_v52 = vpop.xlane.xlu2 %1442 }
 0x3f8   :  { %v1519_v22 = vsub.f32 %v3554_v17, %v1443_v52 }
 0x3fa   :  { %v3684_v33 = vpop.eup %3031  ;;  %v1560_v58 = vmul.f32 1.442695, %v1519_v22 }
 0x3fb   :  { %v1627_v15 = vsel %vm64_vm0, %v3684_v33, 0.0  ;;  %v3689_v4 = vpop.eup %3033 }
 0x3fc   :  { %1628 = vadd.xlane.f32.xlu0 %v1627_v15  ;;  %v1645_v35 = vsel %vm64_vm0, %v3689_v4, 0.0  ;;  %v3695_v53 = vpop.eup %3035  ;;  %v1473_v15 = vpop.xlane.xlu0 %1472 }
 0x3fd   :  { %v1648_v18 = vsel %vm64_vm0, %v3695_v53, 0.0 }
 0x3ff   :  { %v1467_v25 = vpop.xlane.xlu2 %1466 }
 0x400   :  { %v1527_v5 = vsub.f32 %v3566_v32, %v1467_v25  ;;  %v1520_v32 = vsub.f32 %v3525_v59, %v1446_v40 }
 0x402   :  { %v1576_v10 = vmul.f32 1.442695, %v1527_v5  ;;  %v1562_v56 = vmul.f32 1.442695, %v1520_v32  ;;  %v1529_v5 = vsub.f32 %v3530_v63, %v1473_v15 }
 0x404   :  { %3037 = vpow2.f32 %v1576_v10  ;;  %1646 = vadd.xlane.f32.xlu0 %v1645_v35  ;;  %v1580_v10 = vmul.f32 1.442695, %v1529_v5 }
 0x405   :  { %3039 = vpow2.f32 %v1560_v58  ;;  %v3737_v58 = vpop.xlane.xlu0 %1490 }
 0x407   :  { %v1461_v19 = vpop.xlane.xlu2 %1460 }
 0x408   :  { %v1525_v49 = vsub.f32 %v3578_v51, %v1461_v19  ;;  %v1470_v51 = vpop.xlane.xlu1 %1469 }
 0x409   :  { %v1528_v60 = vsub.f32 %v3538_v3, %v1470_v51 }
 0x40a   :  { %v3698_v47 = vpop.eup %3037  ;;  %v1572_v20 = vmul.f32 1.442695, %v1525_v49 }
 0x40b   :  { %v1657_v17 = vsel %vm64_vm0, %v3698_v47, 0.0  ;;  %v3708_v41 = vpop.eup %3039  ;;  %v1578_v52 = vmul.f32 1.442695, %v1528_v60 }
 0x40c   :  { %3041 = vpow2.f32 %v1572_v20  ;;  %1658 = vadd.xlane.f32.xlu2 %v1657_v17  ;;  %1649 = vadd.xlane.f32.xlu0 %v1648_v18  ;;  %v1633_v37 = vsel %vm64_vm0, %v3708_v41, 0.0 }
 0x40d   :  { %3043 = vpow2.f32 %v1562_v56  ;;  %v3745_v32 = vpop.xlane.xlu0 %1475 }
 0x40e   :  { %2988 = vxpose.xlu1.b32.start.end [1/1] (short) (narrow) %v2987_v54, 32  ;;  %3045 = vpow2.f32 %v1578_v52 }
 0x40f   :  { %v1449_v6 = vpop.xlane.xlu2 %1448 }
 0x410   :  { %v1521_v54 = vsub.f32 %v3588_v62, %v1449_v6 }
 0x412   :  { %v3710_v59 = vpop.eup %3041  ;;  %v1564_v3 = vmul.f32 1.442695, %v1521_v54 }
 0x413   :  { %v1651_v0 = vsel %vm64_vm0, %v3710_v59, 0.0  ;;  %v3719_v50 = vpop.eup %3043 }
 0x414   :  { %1652 = vadd.xlane.f32.xlu2 %v1651_v0  ;;  %1634 = vadd.xlane.f32.xlu0 %v1633_v37  ;;  %v1636_v2 = vsel %vm64_vm0, %v3719_v50, 0.0  ;;  %v3726_v25 = vpop.eup %3045  ;;  %3047 = vpow2.f32 %v1564_v3 }
 0x415   :  { %v1660_v22 = vsel %vm64_vm0, %v3726_v25, 0.0  ;;  %3049 = vpow2.f32 %v1580_v10  ;;  %v3752_v56 = vpop.xlane.xlu0 %1502 }
 0x417   :  { %v3717_v45 = vpop.xlane.xlu2 %1499 }
 0x41a   :  { %v3733_v62 = vpop.eup %3047 }
 0x41b   :  { %v1639_v40 = vsel %vm64_vm0, %v3733_v62, 0.0  ;;  %v3741_v63 = vpop.eup %3049 }
 0x41c   :  { %1637 = vadd.xlane.f32.xlu2 %v1636_v2  ;;  %v1663_v49 = vsel %vm64_vm0, %v3741_v63, 0.0 }
 0x41d   :  { %v3754_v37 = vpop.xlane.xlu0 %1496 }
 0x41f   :  { %v3724_v16 = vpop.xlane.xlu2 %1493 }
 0x424   :  { %1661 = vadd.xlane.f32.xlu2 %v1660_v22 }
 0x427   :  { %v3731_v35 = vpop.xlane.xlu2 %1478 }
 0x42c   :  { %1640 = vadd.xlane.f32.xlu2 %v1639_v40 }
 0x42f   :  { %v3739_v19 = vpop.xlane.xlu2 %1481 }
 0x434   :  { %1664 = vadd.xlane.f32.xlu2 %v1663_v49 }
 0x437   :  { %v3747_v20 = vpop.xlane.xlu2 %1505  ;;  %v1608_v17 = vpop.xlane.xlu1 %1607 }
 0x438   :  { %3051 = vrcp.f32 %v1608_v17 }
 0x43d   :  { %2944 = vxpose.xlu0.b32.start.end [1/1] (short) (narrow) %v2943_v28, 32 }
 0x43e   :  { %v3052_v60 = vpop.eup %3051 }
 0x43f   :  { %v1620_v18 = vpop.xlane.xlu2 %1619  ;;  %v1734_v52 = vmul.f32 %v3052_v60, %v3629_v1 }
 0x440   :  { %3053 = vrcp.f32 %v1620_v18  ;;  %v3760_v18 = vpop.xlane.xlu0 %1484 }
 0x441   :  { %v1766_v28 = vpack.c.bf16 %v1734_v52, %v1734_v52 }
 0x443   :  { %v1802_v10 = vunpack.c.l.b16 %v1766_v28 }
 0x446   :  { %v3054_v0 = vpop.eup %3053 }
 0x447   :  { %v1611_v51 = vpop.xlane.xlu2 %1610  ;;  %v1623_v6 = vpop.xlane.xlu1 %1622  ;;  %v1738_v54 = vmul.f32 %v3054_v0, %v3634_v14 }
 0x448   :  { %3055 = vrcp.f32 %v1611_v51 }
 0x449   :  { %3057 = vrcp.f32 %v1623_v6  ;;  %v1770_v3 = vpack.c.bf16 %v1738_v54, %v1738_v54 }
 0x44b   :  { %v1849_v49 = vunpack.c.l.b16 %v1770_v3 }
 0x44e   :  { %v3056_v26 = vpop.eup %3055 }
 0x44f   :  { %v3058_v27 = vpop.eup %3057  ;;  %v1735_v2 = vmul.f32 %v3056_v26, %v3643_v24  ;;  %v1614_v14 = vpop.xlane.xlu2 %1613  ;;  %v4065_v24 = vpack.i.bf16 %v3410_v34, %v3408_v31 }
 0x450   :  { %v1739_v15 = vmul.f32 %v3058_v27, %v3646_v48  ;;  %v3767_v48 = vpop.xlane.xlu0 %1508  ;;  %3059 = vrcp.f32 %v1614_v14  ;;  %v1531_v14 = vsub.f32 %v3613_v13, %v3731_v35  ;;  %v1530_v35 = vsub.f32 %v3559_v21, %v3745_v32 }
 0x451   :  { %v1767_v5 = vpack.c.bf16 %v1735_v2, %v1735_v2 }
 0x452   :  { %v1771_v22 = vpack.c.bf16 %v1739_v15, %v1739_v15 }
 0x453   :  { %v1803_v40 = vunpack.c.l.b16 %v1767_v5 }
 0x454   :  { %v1850_v17 = vunpack.c.l.b16 %v1771_v22 }
 0x455   :  { %v1806_v51 = vpack.c.b16 %v1803_v40, %v1802_v10 }
 0x456   :  { %v1853_v1 = vpack.c.b16 %v1850_v17, %v1849_v49  ;;  %v3060_v0 = vpop.eup %3059 }
 0x457   :  { %2749 = vmatmul.msk.bf16.vlgmr.msrb.gmra.mxu3 %vm64_vm0, %v1806_v51  ;;  %v1626_v6 = vpop.xlane.xlu2 %1625  ;;  %v1736_v52 = vmul.f32 %v3060_v0, %v3657_v38 }
 0x458   :  { %2751 = vmatmul.msk.bf16.vlgmr.msrb.gmra.mxu1 %vm64_vm0, %v1853_v1 }
 0x459   :  { %v1768_v28 = vpack.c.bf16 %v1736_v52, %v1736_v52 }
 0x45b   :  { %v1804_v31 = vunpack.c.l.b16 %v1768_v28 }
 0x45d   :  { %2966 = vxpose.xlu2.b32.start.end [1/1] (short) (narrow) %v4065_v24, 32  ;;  %v1584_v24 = vmul.f32 1.442695, %v1531_v14 }
 0x467   :  { %v1617_v60 = vpop.xlane.xlu0 %1616 }
 0x468   :  { %3061 = vrcp.f32 %v1617_v60 }
 0x469   :  { %3063 = vrcp.f32 %v1626_v6 }
 0x46e   :  { %v3062_v54 = vpop.eup %3061 }
 0x46f   :  { %v1629_v26 = vpop.xlane.xlu0 %1628  ;;  %v1737_v27 = vmul.f32 %v3062_v54, %v3677_v57  ;;  %v3064_v2 = vpop.eup %3063  ;;  %v1526_v57 = vsub.f32 %v3488_v36, %v3672_v42  ;;  %v1582_v54 = vmul.f32 1.442695, %v1530_v35 }
 0x470   :  { %3065 = vrcp.f32 %v1629_v26  ;;  %v1740_v15 = vmul.f32 %v3064_v2, %v3662_v29  ;;  %v3779_v29 = vadd.f32 %v3517_v55, %v3445_v61  ;;  %v3793_v55 = vpop.xlane.xlu2 %1643 }
 0x471   :  { %v1769_v3 = vpack.c.bf16 %v1737_v27, %v1737_v27  ;;  %v1574_v1 = vmul.f32 1.442695, %v1526_v57 }
 0x472   :  { %v1772_v40 = vpack.c.bf16 %v1740_v15, %v1740_v15 }
 0x473   :  { %v1805_v34 = vunpack.c.l.b16 %v1769_v3  ;;  %3067 = vpow2.f32 %v1574_v1 }
 0x474   :  { %v1851_v49 = vunpack.c.l.b16 %v1772_v40  ;;  %3069 = vpow2.f32 %v1584_v24 }
 0x475   :  { %v1807_v5 = vpack.c.b16 %v1805_v34, %v1804_v31  ;;  %3071 = vpow2.f32 %v1582_v54  ;;  %v1541_v31 = vsub.f32 %v3601_v8, %v3767_v48 }
 0x476   :  { %v3066_v22 = vpop.eup %3065 }
 0x477   :  { %2750 = vmatmul.msk.bf16.gmra.mxu3 %vm64_vm0, %v1807_v5  ;;  %v1741_v10 = vmul.f32 %v3066_v22, %v3684_v33  ;;  %v1486_v33 = vsel %vm64_vm0, %v3779_v29, -inf  ;;  %v1604_v40 = vmul.f32 1.442695, %v1541_v31 }
 0x478   :  { %v1632_v60 = vpop.xlane.xlu2 %1631 }
 0x479   :  { %v1773_v38 = vpack.c.bf16 %v1741_v10, %v1741_v10  ;;  %v3785_v6 = vpop.eup %3067  ;;  %3073 = vpow2.f32 %v1604_v40 }
 0x47a   :  { %v1654_v36 = vsel %vm64_vm0, %v3785_v6, 0.0  ;;  %v3789_v42 = vpop.eup %3069 }
 0x47b   :  { %v1852_v17 = vunpack.c.l.b16 %v1773_v38  ;;  %4066 = vst [vmem:[#allocation6_spill] sm:$0xff] %v3789_v42  ;;  %v1669_v61 = vsel %vm64_vm0, %v3789_v42, 0.0 }
 0x47d   :  { %v1854_v51 = vpack.c.b16 %v1852_v17, %v1851_v49  ;;  %v3805_v17 = vpop.eup %3071 }
 0x47e   :  { %4067 = vst [vmem:[#allocation7_spill] sm:$0xff] %v3805_v17  ;;  %v1666_v8 = vsel %vm64_vm0, %v3805_v17, 0.0 }
 0x47f   :  { %2752 = vmatmul.msk.bf16.gmra.mxu1 %vm64_vm0, %v1854_v51  ;;  %v1647_v51 = vpop.xlane.xlu0 %1646 }
 0x480   :  { %v3799_v34 = vpop.xlane.xlu2 %1658 }
 0x486   :  { %1487 = vmax.xlane.f32.xlu1 %v1486_v33  ;;  %v3814_v33 = vpop.eup %3073 }
 0x487   :  { %4068 = vst [vmem:[#allocation8_spill] sm:$0xff] %v3814_v33 }
 0x488   :  { %v3812_v1 = vpop.xlane.xlu2 %1652 }
 0x48e   :  { %1655 = vadd.xlane.f32.xlu1 %v1654_v36 }
 0x490   :  { %v3823_v54 = vpop.xlane.xlu2 %1637 }
 0x496   :  { %1670 = vadd.xlane.f32.xlu1 %v1669_v61  ;;  %v1699_v61 = vsel %vm64_vm0, %v3814_v33, 0.0 }
 0x4b2   :  { %v2989_v13 = vpop.trf.xlu1 }
 0x4b3   :  { %v2993_v0 = vunpack.i.h.bf16 %v2989_v13  ;;  %v2990_v52 = vunpack.i.l.bf16 %v2989_v13 }
 0x4b5   :  { %v1101_v26 = vpack.c.bf16 %v2993_v0, %v2993_v0  ;;  %v1097_v27 = vpack.c.bf16 %v2990_v52, %v2990_v52  ;;  %v3821_v0 = vpop.xlane.xlu0 %1649 }
 0x4b7   :  { %v2094_v22 = vunpack.c.l.b16 %v1097_v27  ;;  %v2141_v21 = vunpack.c.l.b16 %v1101_v26  ;;  %v1539_v27 = vsub.f32 %v3571_v39, %v3752_v56 }
 0x4ba   :  { %v2994_v28 = vpop.trf.xlu1 }
 0x4bb   :  { %v2998_v2 = vunpack.i.h.bf16 %v2994_v28  ;;  %v2995_v3 = vunpack.i.l.bf16 %v2994_v28  ;;  %v1600_v28 = vmul.f32 1.442695, %v1539_v27 }
 0x4bd   :  { %v1102_v15 = vpack.c.bf16 %v2998_v2, %v2998_v2  ;;  %v1098_v5 = vpack.c.bf16 %v2995_v3, %v2995_v3  ;;  %v1635_v2 = vpop.xlane.xlu0 %1634  ;;  %v3829_v3 = vpop.xlane.xlu2 %1661  ;;  %3075 = vpow2.f32 %v1600_v28 }
 0x4be   :  { %3077 = vrcp.f32 %v3793_v55 }
 0x4bf   :  { %v2095_v10 = vunpack.c.l.b16 %v1098_v5  ;;  %v2142_v32 = vunpack.c.l.b16 %v1102_v15  ;;  %3079 = vrcp.f32 %v1632_v60 }
 0x4c0   :  { %3081 = vrcp.f32 %v1647_v51 }
 0x4c1   :  { %v3801_v38 = vpack.c.b16 %v2095_v10, %v2094_v22  ;;  %v3803_v49 = vpack.c.b16 %v2142_v32, %v2141_v21  ;;  %3083 = vrcp.f32 %v1635_v2 }
 0x4c2   :  { %v3807_v57 = vpop.trf.xlu1 }
 0x4c3   :  { %v3003_v48 = vunpack.i.h.bf16 %v3807_v57  ;;  %v3831_v22 = vpop.eup %3075  ;;  %v3000_v55 = vunpack.i.l.bf16 %v3807_v57 }
 0x4c4   :  { %4069 = vst [vmem:[#allocation9_spill] sm:$0xff] %v3831_v22  ;;  %v1693_v39 = vsel %vm64_vm0, %v3831_v22, 0.0 }
 0x4c5   :  { %v1103_v14 = vpack.c.bf16 %v3003_v48, %v3003_v48  ;;  %v3833_v32 = vpop.xlane.xlu2 %1640  ;;  %v1099_v57 = vpack.c.bf16 %v3000_v55, %v3000_v55 }
 0x4c6   :  { %1667 = vadd.xlane.f32.xlu0 %v1666_v8 }
 0x4c7   :  { %v2143_v13 = vunpack.c.l.b16 %v1103_v14  ;;  %v1535_v14 = vsub.f32 %v3545_v7, %v3737_v58 }
 0x4ca   :  { %v3816_v24 = vpop.trf.xlu1 }
 0x4cb   :  { %v3008_v36 = vunpack.i.h.bf16 %v3816_v24  ;;  %v3005_v2 = vunpack.i.l.bf16 %v3816_v24 }
 0x4cd   :  { %v1104_v35 = vpack.c.bf16 %v3008_v36, %v3008_v36  ;;  %v3846_v36 = vpop.xlane.xlu2 %1664 }
 0x4ce   :  { %1700 = vadd.xlane.f32.xlu0 %v1699_v61 }
 0x4cf   :  { %v2144_v52 = vunpack.c.l.b16 %v1104_v35  ;;  %v3078_v35 = vpop.eup %3077 }
 0x4d0   :  { %v3080_v28 = vpop.eup %3079  ;;  %v1746_v58 = vmul.f32 %v3078_v35, %v3668_v43 }
 0x4d1   :  { %v3825_v26 = vpack.c.b16 %v2144_v52, %v2143_v13  ;;  %v1592_v13 = vmul.f32 1.442695, %v1535_v14  ;;  %v3082_v7 = vpop.eup %3081  ;;  %v1742_v51 = vmul.f32 %v3080_v28, %v3674_v9 }
 0x4d2   :  { %v3084_v60 = vpop.eup %3083  ;;  %v1747_v17 = vmul.f32 %v3082_v7, %v3689_v4 }
 0x4d3   :  { %3085 = vpow2.f32 %v1592_v13  ;;  %v1743_v43 = vmul.f32 %v3084_v60, %v3708_v41 }
 0x4d4   :  { %v1779_v41 = vpack.c.bf16 %v1747_v17, %v1747_v17 }
 0x4d5   :  { %v1775_v55 = vpack.c.bf16 %v1743_v43, %v1743_v43 }
 0x4d7   :  { %v1897_v17 = vunpack.c.l.b16 %v1775_v55 }
 0x4d9   :  { %v3857_v9 = vpop.eup %3085 }
 0x4da   :  { %v1835_v31 = vpop.f32.mrf.mxu3 }
 0x4db   :  { %v2174_v15 = vpack.c.bf16 %v1835_v31, %v1835_v31 }
 0x4dd   :  { %v3835_v40 = vunpack.c.l.b16 %v2174_v15 }
 0x4df   :  { %4070 = vst [vmem:[#allocation10_spill] sm:$0xff] %v3835_v40 }
 0x4e1   :  { %v2945_v5 = vpop.trf.xlu0 }
 0x4e2   :  { %v1837_v10 = vpop.f32.mrf.mxu3  ;;  %v2949_v31 = vunpack.i.h.bf16 %v2945_v5  ;;  %v2946_v15 = vunpack.i.l.bf16 %v2945_v5 }
 0x4e3   :  { %v2175_v21 = vpack.c.bf16 %v1837_v10, %v1837_v10 }
 0x4e4   :  { %v1081_v56 = vpack.c.bf16 %v2949_v31, %v2949_v31  ;;  %v1085_v40 = vpack.c.bf16 %v2946_v15, %v2946_v15  ;;  %v1100_v31 = vpack.c.bf16 %v3005_v2, %v3005_v2  ;;  %v1944_v2 = vunpack.c.l.b16 %v1779_v41 }
 0x4e5   :  { %v3837_v8 = vunpack.c.l.b16 %v2175_v21 }
 0x4e6   :  { %1694 = vadd.xlane.f32.xlu2 %v1693_v39 }
 0x4e7   :  { %4071 = vst [vmem:[#allocation11_spill] sm:$0xff] %v3837_v8 }
 0x4e9   :  { %v2950_v48 = vpop.trf.xlu0 }
 0x4ea   :  { %v2954_v10 = vunpack.i.h.bf16 %v2950_v48  ;;  %v2951_v21 = vunpack.i.l.bf16 %v2950_v48 }
 0x4ec   :  { %v1082_v5 = vpack.c.bf16 %v2954_v10, %v2954_v10  ;;  %v1086_v8 = vpack.c.bf16 %v2951_v21, %v2951_v21  ;;  %v1906_v10 = vunpack.c.l.b16 %v1081_v56  ;;  %v1953_v21 = vunpack.c.l.b16 %v1085_v40 }
 0x4ee   :  { %v1907_v4 = vunpack.c.l.b16 %v1082_v5  ;;  %v1954_v7 = vunpack.c.l.b16 %v1086_v8 }
 0x4f0   :  { %v1910_v40 = vpack.c.b16 %v1907_v4, %v1906_v10  ;;  %v1957_v56 = vpack.c.b16 %v1954_v7, %v1953_v21 }
 0x4f1   :  { %v2955_v61 = vpop.trf.xlu0 }
 0x4f2   :  { %v2959_v52 = vunpack.i.h.bf16 %v2955_v61  ;;  %v2956_v27 = vunpack.i.l.bf16 %v2955_v61 }
 0x4f4   :  { %v1083_v14 = vpack.c.bf16 %v2959_v52, %v2959_v52  ;;  %v1087_v61 = vpack.c.bf16 %v2956_v27, %v2956_v27 }
 0x4f6   :  { %v3848_v39 = vpop.trf.xlu2  ;;  %v1908_v24 = vunpack.c.l.b16 %v1083_v14  ;;  %v1955_v52 = vunpack.c.l.b16 %v1087_v61  ;;  %v1774_v14 = vpack.c.bf16 %v1742_v51, %v1742_v51 }
 0x4f9   :  { %v2960_v48 = vpop.trf.xlu0  ;;  %v1488_v13 = vpop.xlane.xlu1 %1487 }
 0x4fa   :  { %v2964_v33 = vunpack.i.h.bf16 %v2960_v48  ;;  %v2961_v22 = vunpack.i.l.bf16 %v2960_v48  ;;  %v1534_v35 = vsub.f32 %v3779_v29, %v1488_v13  ;;  %v1778_v29 = vpack.c.bf16 %v1746_v58, %v1746_v58 }
 0x4fc   :  { %v1084_v27 = vpack.c.bf16 %v2964_v33, %v2964_v33  ;;  %v1088_v28 = vpack.c.bf16 %v2961_v22, %v2961_v22  ;;  %v1590_v15 = vmul.f32 1.442695, %v1534_v35  ;;  %v2096_v33 = vunpack.c.l.b16 %v1099_v57 }
 0x4fd   :  { %v2097_v22 = vunpack.c.l.b16 %v1100_v31  ;;  %v1536_v35 = vsub.f32 %v3608_v23, %v3724_v16 }
 0x4fe   :  { %v1909_v42 = vunpack.c.l.b16 %v1084_v27  ;;  %v1956_v12 = vunpack.c.l.b16 %v1088_v28  ;;  %v3859_v48 = vpop.trf.xlu2  ;;  %3087 = vpow2.f32 %v1590_v15  ;;  %v2968_v28 = vunpack.i.l.bf16 %v3848_v39 }
 0x4ff   :  { %3089 = vrcp.f32 %v3812_v1  ;;  %v1896_v1 = vunpack.c.l.b16 %v1774_v14  ;;  %v2099_v51 = vpack.c.b16 %v2097_v22, %v2096_v33  ;;  %v2973_v31 = vunpack.i.l.bf16 %v3859_v48 }
 0x500   :  { %v1911_v60 = vpack.c.b16 %v1909_v42, %v1908_v24  ;;  %v1958_v13 = vpack.c.b16 %v1956_v12, %v1955_v52  ;;  %3091 = vrcp.f32 %v3833_v32  ;;  %v1538_v12 = vsub.f32 %v3598_v11, %v3717_v45 }
 0x501   :  { %3093 = vrcp.f32 %v3821_v0  ;;  %v1943_v42 = vunpack.c.l.b16 %v1778_v29  ;;  %v1656_v58 = vpop.xlane.xlu1 %1655  ;;  %v1900_v43 = vpack.c.b16 %v1897_v17, %v1896_v1  ;;  %v1594_v16 = vmul.f32 1.442695, %v1536_v35 }
 0x502   :  { %1926 = vmatpush.bf16.msra.mxu0 %v1911_v60  ;;  %1973 = vmatpush.bf16.msra.mxu3 %v1958_v13  ;;  %3095 = vrcp.f32 %v3823_v54  ;;  %v1598_v11 = vmul.f32 1.442695, %v1538_v12  ;;  %v1089_v7 = vpack.c.bf16 %v2968_v28, %v2968_v28  ;;  %v1090_v41 = vpack.c.bf16 %v2973_v31, %v2973_v31 }
 0x503   :  { %v1947_v5 = vpack.c.b16 %v1944_v2, %v1943_v42  ;;  %3097 = vrcp.f32 %v1656_v58  ;;  %v2971_v35 = vunpack.i.h.bf16 %v3848_v39 }
 0x504   :  { %v3865_v8 = vpop.eup %3087  ;;  %3099 = vrcp.f32 %v3799_v34  ;;  %v2000_v12 = vunpack.c.l.b16 %v1089_v7  ;;  %v2001_v42 = vunpack.c.l.b16 %v1090_v41  ;;  %v4072_v41 = vld [vmem:[#allocation5_spill] sm:$0xff] }
 0x505   :  { %v1678_v61 = vsel %vm64_vm0, %v3865_v8, 0.0  ;;  %v3090_v0 = vpop.eup %3089  ;;  %3101 = vpow2.f32 %v1598_v11 }
 0x506   :  { %1927 = vmatpush.bf16.msra.mxu0 %v1910_v40  ;;  %1974 = vmatpush.bf16.msra.mxu3 %v1957_v56  ;;  %v3869_v32 = vpop.trf.xlu2  ;;  %v3092_v54 = vpop.eup %3091  ;;  %v1749_v27 = vmul.f32 %v3090_v0, %v3710_v59  ;;  %3103 = vpow2.f32 %v1594_v16 }
 0x507   :  { %1679 = vadd.xlane.f32.xlu1 %v1678_v61  ;;  %v3094_v57 = vpop.eup %3093  ;;  %v2978_v24 = vunpack.i.l.bf16 %v3869_v32  ;;  %v1745_v52 = vmul.f32 %v3092_v54, %v3733_v62  ;;  %3105 = vrcp.f32 %v3846_v36  ;;  %v1532_v36 = vsub.f32 %v3618_v30, %v3739_v19 }
 0x508   :  { %v3096_v45 = vpop.eup %3095  ;;  %v1748_v15 = vmul.f32 %v3094_v57, %v3695_v53  ;;  %v1781_v4 = vpack.c.bf16 %v1749_v27, %v1749_v27  ;;  %3107 = vrcp.f32 %v3829_v3  ;;  %v1093_v3 = vpack.c.bf16 %v2971_v35, %v2971_v35 }
 0x509   :  { %2753 = vmatmul.msk.bf16.vlgmr.msra.gmra.mxu0 %vm64_vm0, %v1900_v43  ;;  %2755 = vmatmul.msk.bf16.vlgmr.msra.gmra.mxu3 %vm64_vm0, %v1947_v5  ;;  %v1744_v10 = vmul.f32 %v3096_v45, %v3719_v50  ;;  %v3098_v23 = vpop.eup %3097  ;;  %v1091_v34 = vpack.c.bf16 %v2978_v24, %v2978_v24  ;;  %v1777_v62 = vpack.c.bf16 %v1745_v52, %v1745_v52  ;;  %v2976_v24 = vunpack.i.h.bf16 %v3859_v48 }
 0x50a   :  { %2114 = vmatpush.bf16.msrb.mxu3 %v2099_v51  ;;  %v3100_v59 = vpop.eup %3099  ;;  %v1780_v29 = vpack.c.bf16 %v1748_v15, %v1748_v15  ;;  %v1750_v53 = vmul.f32 %v3098_v23, %v3785_v6  ;;  %v1537_v50 = vsub.f32 %v3581_v46, %v3754_v37  ;;  %v1946_v56 = vunpack.c.l.b16 %v1781_v4 }
 0x50b   :  { %v1776_v60 = vpack.c.bf16 %v1744_v10, %v1744_v10  ;;  %v2002_v13 = vunpack.c.l.b16 %v1091_v34  ;;  %v3891_v33 = vpop.eup %3101  ;;  %v1751_v22 = vmul.f32 %v3100_v59, %v3698_v47  ;;  %v1899_v40 = vunpack.c.l.b16 %v1777_v62 }
 0x50c   :  { %v1945_v17 = vunpack.c.l.b16 %v1780_v29  ;;  %v1782_v1 = vpack.c.bf16 %v1750_v53, %v1750_v53  ;;  %v2981_v6 = vunpack.i.h.bf16 %v3869_v32  ;;  %v1690_v46 = vsel %vm64_vm0, %v3891_v33, 0.0  ;;  %v3898_v54 = vpop.eup %3103  ;;  %v1671_v53 = vpop.xlane.xlu1 %1670 }
 0x50d   :  { %v1898_v51 = vunpack.c.l.b16 %v1776_v60  ;;  %v1783_v61 = vpack.c.bf16 %v1751_v22, %v1751_v22  ;;  %v1596_v47 = vmul.f32 1.442695, %v1537_v50  ;;  %v2004_v43 = vpack.c.b16 %v2001_v42, %v2000_v12  ;;  %v3106_v31 = vpop.eup %3105  ;;  %v4073_v22 = vld [vmem:[#allocation6_spill] sm:$0xff]  ;;  %v4074_v12 = vld [vmem:[#allocation7_spill] sm:$0xff] }
 0x50e   :  { %2115 = vmatpush.bf16.msrb.mxu3 %v3801_v38  ;;  %v2982_v21 = vpop.trf.xlu2  ;;  %v1681_v38 = vsel %vm64_vm0, %v3857_v9, 0.0  ;;  %v1948_v5 = vpack.c.b16 %v1946_v56, %v1945_v17  ;;  %v1990_v57 = vunpack.c.l.b16 %v1782_v1  ;;  %v1095_v11 = vpack.c.bf16 %v2981_v6, %v2981_v6  ;;  %v3108_v39 = vpop.eup %3107 }
 0x50f   :  { %1682 = vadd.xlane.f32.xlu1 %v1681_v38  ;;  %v2983_v55 = vunpack.i.l.bf16 %v2982_v21  ;;  %v2986_v58 = vunpack.i.h.bf16 %v2982_v21  ;;  %v1901_v0 = vpack.c.b16 %v1899_v40, %v1898_v51  ;;  %v1991_v45 = vunpack.c.l.b16 %v1783_v61  ;;  %v2209_v51 = vld [vmem:[%s4052_s8 + $0xc] sm:$0xf]  ;;  %v3942_v61 = vpop.f32.mrf.mxu3 }
 0x510   :  { %3109 = vpow2.f32 %v1596_v47  ;;  %v2049_v27 = vunpack.c.l.b16 %v1095_v11  ;;  %v1684_v15 = vsel %vm64_vm0, %v3898_v54, 0.0  ;;  %v1094_v10 = vpack.c.bf16 %v2976_v24, %v2976_v24 }
 0x511   :  { %v1092_v14 = vpack.c.bf16 %v2983_v55, %v2983_v55  ;;  %v1096_v32 = vpack.c.bf16 %v2986_v58, %v2986_v58  ;;  %v1994_v52 = vpack.c.b16 %v1991_v45, %v1990_v57  ;;  %v1586_v48 = vmul.f32 1.442695, %v1532_v36 }
 0x512   :  { %v1753_v30 = vmul.f32 %v3106_v31, %v3741_v63  ;;  %v2047_v16 = vunpack.c.l.b16 %v1093_v3  ;;  %v2048_v34 = vunpack.c.l.b16 %v1094_v10  ;;  %v1533_v21 = vsub.f32 %v3591_v44, %v3760_v18 }
 0x513   :  { %v2003_v2 = vunpack.c.l.b16 %v1092_v14  ;;  %v2050_v28 = vunpack.c.l.b16 %v1096_v32  ;;  %3111 = vpow2.f32 %v1586_v48  ;;  %v1540_v55 = vsub.f32 %v4072_v41, %v3747_v20 }
 0x514   :  { %v1785_v38 = vpack.c.bf16 %v1753_v30, %v1753_v30  ;;  %v2051_v62 = vpack.c.b16 %v2048_v34, %v2047_v16  ;;  %v1588_v63 = vmul.f32 1.442695, %v1533_v21  ;;  %v2207_v34 = vld [vmem:[%s4052_s8 + $0x4] sm:$0xf] }
 0x515   :  { %v2005_v37 = vpack.c.b16 %v2003_v2, %v2002_v13  ;;  %v2052_v19 = vpack.c.b16 %v2050_v28, %v2049_v27  ;;  %v1602_v18 = vmul.f32 1.442695, %v1540_v55  ;;  %v4075_v28 = vld [vmem:[#allocation9_spill] sm:$0xff] }
 0x516   :  { %v3913_v23 = vpop.eup %3109  ;;  %v1993_v59 = vunpack.c.l.b16 %v1785_v38  ;;  %3113 = vpow2.f32 %v1588_v63 }
 0x517   :  { %1691 = vadd.xlane.f32.xlu1 %v1690_v46  ;;  %2020 = vmatpush.bf16.msra.mxu1 %v2005_v37  ;;  %v1687_v4 = vsel %vm64_vm0, %v3913_v23, 0.0  ;;  %3115 = vrcp.f32 %v1671_v53  ;;  %v2345_v46 = vsel %vm141_vm2, %v2209_v51, 0  ;;  %v3944_v57 = vpop.f32.mrf.mxu3 }
 0x518   :  { %2067 = vmatpush.bf16.msrb.mxu0 %v2052_v19  ;;  %3117 = vpow2.f32 %v1602_v18  ;;  %2354 = vmatpush.bf16.msrb.mxu2 %v2345_v46  ;;  %v1882_v18 = vpop.f32.mrf.mxu1 }
 0x519   :  { %2754 = vmatmul.msk.bf16.gmra.mxu0 %vm64_vm0, %v1901_v0  ;;  %2756 = vmatmul.msk.bf16.gmra.mxu3 %vm64_vm0, %v1948_v5  ;;  %v3920_v7 = vpop.eup %3111 }
 0x51a   :  { %v1672_v44 = vsel %vm64_vm0, %v3920_v7, 0.0 }
 0x51b   :  { %2021 = vmatpush.bf16.msra.mxu1 %v2004_v43 }
 0x51c   :  { %2068 = vmatpush.bf16.msrb.mxu0 %v2051_v62  ;;  %v3927_v60 = vpop.eup %3113  ;;  %v2269_v62 = vsel %vm141_vm2, %v2207_v34, 0 }
 0x51d   :  { %v1675_v50 = vsel %vm64_vm0, %v3927_v60, 0.0  ;;  %v3116_v14 = vpop.eup %3115  ;;  %2278 = vmatpush.bf16.msra.mxu3 %v2269_v62 }
 0x51e   :  { %2757 = vmatmul.msk.bf16.vlgmr.msra.gmra.mxu1 %vm64_vm0, %v1994_v52  ;;  %v3931_v20 = vpop.eup %3117  ;;  %v1755_v40 = vmul.f32 %v3116_v14, %v4073_v22 }
 0x51f   :  { %2161 = vmatpush.bf16.msrb.mxu1 %v3825_v26  ;;  %1685 = vadd.xlane.f32.xlu1 %v1684_v15  ;;  %v1752_v26 = vmul.f32 %v3108_v39, %v3726_v25  ;;  %v1696_v56 = vsel %vm64_vm0, %v3931_v20, 0.0 }
 0x520   :  { %v1787_v17 = vpack.c.bf16 %v1755_v40, %v1755_v40 }
 0x522   :  { %v2038_v6 = vunpack.c.l.b16 %v1787_v17 }
 0x523   :  { %2162 = vmatpush.bf16.msrb.mxu1 %v3803_v49  ;;  %v1784_v49 = vpack.c.bf16 %v1752_v26, %v1752_v26 }
 0x525   :  { %v1992_v25 = vunpack.c.l.b16 %v1784_v49 }
 0x527   :  { %1688 = vadd.xlane.f32.xlu1 %v1687_v4  ;;  %v1995_v29 = vpack.c.b16 %v1993_v59, %v1992_v25 }
 0x52e   :  { %2758 = vmatmul.msk.bf16.gmra.mxu1 %vm64_vm0, %v1995_v29 }
 0x52f   :  { %1673 = vadd.xlane.f32.xlu1 %v1672_v44 }
 0x537   :  { %1676 = vadd.xlane.f32.xlu1 %v1675_v50 }
 0x539   :  { %v1668_v13 = vpop.xlane.xlu0 %1667 }
 0x53a   :  { %3119 = vrcp.f32 %v1668_v13 }
 0x53f   :  { %1697 = vadd.xlane.f32.xlu1 %v1696_v56 }
 0x540   :  { %v3120_v2 = vpop.eup %3119 }
 0x541   :  { %v1754_v42 = vmul.f32 %v3120_v2, %v4074_v12  ;;  %v2206_v2 = vld [vmem:[%s4052_s8] sm:$0xf] }
 0x543   :  { %v1786_v1 = vpack.c.bf16 %v1754_v42, %v1754_v42 }
 0x545   :  { %v2037_v58 = vunpack.c.l.b16 %v1786_v1 }
 0x547   :  { %v2041_v37 = vpack.c.b16 %v2038_v6, %v2037_v58  ;;  %v1701_v58 = vpop.xlane.xlu0 %1700 }
 0x549   :  { %2759 = vmatmul.msk.bf16.vlgmr.msrb.gmra.mxu0 %vm64_vm0, %v2041_v37 }
 0x559   :  { %v1695_v5 = vpop.xlane.xlu2 %1694 }
 0x57a   :  { %v1680_v0 = vpop.xlane.xlu1 %1679 }
 0x57b   :  { %3121 = vrcp.f32 %v1680_v0  ;;  %v1884_v0 = vpop.f32.mrf.mxu1 }
 0x581   :  { %v3122_v43 = vpop.eup %3121 }
 0x582   :  { %v1683_v47 = vpop.xlane.xlu1 %1682  ;;  %v1758_v11 = vmul.f32 %v3122_v43, %v3865_v8 }
 0x583   :  { %3123 = vrcp.f32 %v1683_v47 }
 0x584   :  { %3125 = vrcp.f32 %v1695_v5  ;;  %v1790_v45 = vpack.c.bf16 %v1758_v11, %v1758_v11  ;;  %v2208_v5 = vld [vmem:[%s4052_s8 + $0x8] sm:$0xf]  ;;  %v2179_v11 = vpack.c.bf16 %v1884_v0, %v1884_v0 }
 0x585   :  { %v2307_v43 = vsel %vm141_vm2, %v2208_v5, 0 }
 0x586   :  { %v2084_v15 = vunpack.c.l.b16 %v1790_v45  ;;  %v3958_v29 = vpop.f32.mrf.mxu0  ;;  %2316 = vmatpush.bf16.msra.mxu1 %v2307_v43  ;;  %v2178_v45 = vpack.c.bf16 %v1882_v18, %v1882_v18 }
 0x589   :  { %v3124_v32 = vpop.eup %3123 }
 0x58a   :  { %v1759_v35 = vmul.f32 %v3124_v32, %v3857_v9  ;;  %v1692_v24 = vpop.xlane.xlu1 %1691  ;;  %v3126_v36 = vpop.eup %3125 }
 0x58b   :  { %3127 = vrcp.f32 %v1692_v24  ;;  %v1763_v31 = vmul.f32 %v3126_v36, %v4075_v28  ;;  %v2211_v28 = vld [vmem:[%s4052_s8 + $0x14] sm:$0xf] }
 0x58c   :  { %v1791_v52 = vpack.c.bf16 %v1759_v35, %v1759_v35  ;;  %v1976_v27 = vpop.f32.mrf.mxu3 }
 0x58d   :  { %v1795_v48 = vpack.c.bf16 %v1763_v31, %v1763_v31  ;;  %v2186_v8 = vpack.c.bf16 %v1976_v27, %v1976_v27  ;;  %v1887_v27 = vpop.f32.mrf.mxu1  ;;  %v2257_v31 = vunpack.c.l.b16 %v2179_v11 }
 0x58e   :  { %v2085_v3 = vunpack.c.l.b16 %v1791_v52  ;;  %v1931_v51 = vpop.f32.mrf.mxu0 }
 0x58f   :  { %v2132_v21 = vunpack.c.l.b16 %v1795_v48  ;;  %v2332_v4 = vunpack.c.l.b16 %v2186_v8  ;;  %v2183_v18 = vpack.c.bf16 %v1931_v51, %v1931_v51 }
 0x590   :  { %v2088_v10 = vpack.c.b16 %v2085_v3, %v2084_v15  ;;  %v2421_v3 = vsel %vm141_vm2, %v2211_v28, 0 }
 0x591   :  { %v3128_v39 = vpop.eup %3127 }
 0x592   :  { %v1762_v30 = vmul.f32 %v3128_v39, %v3891_v33  ;;  %v1686_v19 = vpop.xlane.xlu1 %1685  ;;  %2761 = vmatmul.msk.bf16.vlgmr.msrb.gmra.mxu3 %vm64_vm0, %v2088_v10  ;;  %v2256_v10 = vunpack.c.l.b16 %v2178_v45  ;;  %v4076_v39 = vld [vmem:[#allocation8_spill] sm:$0xff] }
 0x593   :  { %3129 = vrcp.f32 %v1686_v19  ;;  %2430 = vmatpush.bf16.msrb.mxu3 %v2421_v3 }
 0x594   :  { %v1794_v26 = vpack.c.bf16 %v1762_v30, %v1762_v30  ;;  %v1978_v9 = vpop.f32.mrf.mxu3 }
 0x595   :  { %v2187_v16 = vpack.c.bf16 %v1978_v9, %v1978_v9 }
 0x596   :  { %v2131_v38 = vunpack.c.l.b16 %v1794_v26  ;;  %v1934_v15 = vpop.f32.mrf.mxu0 }
 0x597   :  { %v2333_v49 = vunpack.c.l.b16 %v2187_v16  ;;  %v2184_v5 = vpack.c.bf16 %v1934_v15, %v1934_v15 }
 0x598   :  { %v2135_v33 = vpack.c.b16 %v2132_v21, %v2131_v38  ;;  %v1889_v21 = vpop.f32.mrf.mxu1 }
 0x599   :  { %v2336_v63 = vpack.c.b16 %v2333_v49, %v2332_v4  ;;  %v3130_v25 = vpop.eup %3129  ;;  %v2181_v49 = vpack.c.bf16 %v1889_v21, %v1889_v21 }
 0x59a   :  { %v1689_v59 = vpop.xlane.xlu1 %1688  ;;  %2763 = vmatmul.msk.bf16.vlgmr.msrb.gmra.mxu1 %vm64_vm0, %v2135_v33  ;;  %v1760_v55 = vmul.f32 %v3130_v25, %v3898_v54  ;;  %v2231_v54 = vsel %vm141_vm2, %v2206_v2, 0 }
 0x59b   :  { %3131 = vrcp.f32 %v1689_v59  ;;  %2771 = vmatmul.msk.bf16.vlgmr.msrb.gmra.mxu2 %vm1119_vm4, %v2336_v63  ;;  %2240 = vmatpush.bf16.msra.mxu0 %v2231_v54  ;;  %v2180_v63 = vpack.c.bf16 %v1887_v27, %v1887_v27  ;;  %v2210_v59 = vld [vmem:[%s4052_s8 + $0x10] sm:$0xf]  ;;  %v2259_v25 = vunpack.c.l.b16 %v2181_v49 }
 0x59c   :  { %v1981_v41 = vpop.f32.mrf.mxu3  ;;  %v1792_v13 = vpack.c.bf16 %v1760_v55, %v1760_v55 }
 0x59d   :  { %v2188_v14 = vpack.c.bf16 %v1981_v41, %v1981_v41  ;;  %v2258_v41 = vunpack.c.l.b16 %v2180_v63 }
 0x59e   :  { %v2086_v17 = vunpack.c.l.b16 %v1792_v13  ;;  %v1936_v38 = vpop.f32.mrf.mxu0  ;;  %v4078_v13 = vld [vmem:[#allocation10_spill] sm:$0xff] }
 0x59f   :  { %v2334_v42 = vunpack.c.l.b16 %v2188_v14 }
 0x5a0   :  { %v2023_v2 = vpop.f32.mrf.mxu1 }
 0x5a1   :  { %v3132_v44 = vpop.eup %3131  ;;  %v2190_v11 = vpack.c.bf16 %v2023_v2, %v2023_v2 }
 0x5a2   :  { %v1674_v53 = vpop.xlane.xlu1 %1673  ;;  %v1761_v50 = vmul.f32 %v3132_v44, %v3913_v23  ;;  %v2261_v44 = vpack.c.b16 %v2259_v25, %v2258_v41 }
 0x5a3   :  { %3133 = vrcp.f32 %v1674_v53  ;;  %v2182_v53 = vpack.c.bf16 %v3958_v29, %v3958_v29 }
 0x5a4   :  { %v1983_v22 = vpop.f32.mrf.mxu3  ;;  %v1793_v40 = vpack.c.bf16 %v1761_v50, %v1761_v50  ;;  %v4077_v50 = vld [vmem:[#allocation11_spill] sm:$0xff] }
 0x5a5   :  { %v2189_v56 = vpack.c.bf16 %v1983_v22, %v1983_v22  ;;  %v4079_v14 = vpack.c.b16 %v4077_v50, %v4078_v13  ;;  %v2295_v22 = vunpack.c.l.b16 %v2183_v18 }
 0x5a6   :  { %v2087_v12 = vunpack.c.l.b16 %v1793_v40  ;;  %v2294_v40 = vunpack.c.l.b16 %v2182_v53 }
 0x5a7   :  { %v2335_v1 = vunpack.c.l.b16 %v2189_v56 }
 0x5a8   :  { %v2089_v6 = vpack.c.b16 %v2087_v12, %v2086_v17  ;;  %v2177_v17 = vpack.c.bf16 %v3944_v57, %v3944_v57  ;;  %v2298_v12 = vpack.c.b16 %v2295_v22, %v2294_v40  ;;  %v2025_v0 = vpop.f32.mrf.mxu1 }
 0x5a9   :  { %v2337_v23 = vpack.c.b16 %v2335_v1, %v2334_v42  ;;  %v3134_v37 = vpop.eup %3133  ;;  %v2176_v42 = vpack.c.bf16 %v3942_v61, %v3942_v61  ;;  %v2191_v61 = vpack.c.bf16 %v2025_v0, %v2025_v0 }
 0x5aa   :  { %v1677_v46 = vpop.xlane.xlu1 %1676  ;;  %2762 = vmatmul.msk.bf16.gmra.mxu3 %vm64_vm0, %v2089_v6  ;;  %v1756_v47 = vmul.f32 %v3134_v37, %v3920_v7  ;;  %v2221_v1 = vunpack.c.l.b16 %v2177_v17 }
 0x5ab   :  { %3135 = vrcp.f32 %v1677_v46  ;;  %2772 = vmatmul.msk.bf16.gmra.mxu2 %vm1119_vm4, %v2337_v23  ;;  %v2185_v46 = vpack.c.bf16 %v1936_v38, %v1936_v38  ;;  %v2371_v45 = vunpack.c.l.b16 %v2191_v61 }
 0x5ac   :  { %3137 = vrcp.f32 %v1701_v58  ;;  %v1788_v36 = vpack.c.bf16 %v1756_v47, %v1756_v47  ;;  %v2220_v58 = vunpack.c.l.b16 %v2176_v42  ;;  %v2296_v47 = vunpack.c.l.b16 %v2184_v5 }
 0x5ad   :  { %v2297_v57 = vunpack.c.l.b16 %v2185_v46 }
 0x5ae   :  { %v2039_v30 = vunpack.c.l.b16 %v1788_v36  ;;  %v2223_v51 = vpack.c.b16 %v2221_v1, %v2220_v58 }
 0x5af   :  { %v2299_v43 = vpack.c.b16 %v2297_v57, %v2296_v47 }
 0x5b1   :  { %v3136_v32 = vpop.eup %3135 }
 0x5b2   :  { %v1698_v35 = vpop.xlane.xlu1 %1697  ;;  %v1757_v24 = vmul.f32 %v3136_v32, %v3927_v60  ;;  %v3138_v52 = vpop.eup %3137  ;;  %v2260_v60 = vpack.c.b16 %v2257_v31, %v2256_v10  ;;  %v2213_v10 = vld [vmem:[%s4052_s8 + $0x1c] sm:$0xf] }
 0x5b3   :  { %3139 = vrcp.f32 %v1698_v35  ;;  %v1765_v48 = vmul.f32 %v3138_v52, %v4076_v39  ;;  %v2028_v32 = vpop.f32.mrf.mxu1  ;;  %v2370_v35 = vunpack.c.l.b16 %v2190_v11  ;;  %v2497_v39 = vsel %vm141_vm2, %v2213_v10, 0 }
 0x5b4   :  { %v1789_v7 = vpack.c.bf16 %v1757_v24, %v1757_v24  ;;  %v2192_v27 = vpack.c.bf16 %v2028_v32, %v2028_v32  ;;  %2506 = vmatpush.bf16.msra.mxu2 %v2497_v39 }
 0x5b5   :  { %v1797_v16 = vpack.c.bf16 %v1765_v48, %v1765_v48  ;;  %v2374_v24 = vpack.c.b16 %v2371_v45, %v2370_v35 }
 0x5b6   :  { %v2040_v19 = vunpack.c.l.b16 %v1789_v7  ;;  %v2372_v31 = vunpack.c.l.b16 %v2192_v27  ;;  %v2212_v7 = vld [vmem:[%s4052_s8 + $0x18] sm:$0xf] }
 0x5b7   :  { %v2134_v4 = vunpack.c.l.b16 %v1797_v16  ;;  %v2459_v3 = vsel %vm141_vm2, %v2212_v7, 0 }
 0x5b8   :  { %v2042_v8 = vpack.c.b16 %v2040_v19, %v2039_v30  ;;  %2468 = vmatpush.bf16.msrb.mxu1 %v2459_v3 }
 0x5b9   :  { %v3140_v26 = vpop.eup %3139 }
 0x5ba   :  { %v1764_v9 = vmul.f32 %v3140_v26, %v3931_v20  ;;  %2760 = vmatmul.msk.bf16.gmra.mxu0 %vm64_vm0, %v2042_v8  ;;  %2767 = vmatmul.msk.bf16.vlgmr.msra.gmra.mxu3 %vm1119_vm4, %v2260_v60  ;;  %v2383_v20 = vsel %vm141_vm2, %v2210_v59, 0 }
 0x5bb   :  { %2392 = vmatpush.bf16.msrb.mxu0 %v2383_v20  ;;  %v2030_v36 = vpop.f32.mrf.mxu1 }
 0x5bc   :  { %v1796_v34 = vpack.c.bf16 %v1764_v9, %v1764_v9  ;;  %v2193_v52 = vpack.c.bf16 %v2030_v36, %v2030_v36 }
 0x5be   :  { %v2133_v62 = vunpack.c.l.b16 %v1796_v34  ;;  %v2373_v28 = vunpack.c.l.b16 %v2193_v52 }
 0x5c0   :  { %v2136_v33 = vpack.c.b16 %v2134_v4, %v2133_v62  ;;  %v2375_v15 = vpack.c.b16 %v2373_v28, %v2372_v31 }
 0x5c2   :  { %2764 = vmatmul.msk.bf16.gmra.mxu1 %vm64_vm0, %v2136_v33 }
 0x5c6   :  { %v2070_v55 = vpop.f32.mrf.mxu0 }
 0x5c7   :  { %v2194_v29 = vpack.c.bf16 %v2070_v55, %v2070_v55 }
 0x5c9   :  { %v2408_v23 = vunpack.c.l.b16 %v2194_v29 }
 0x5ca   :  { %2765 = vmatmul.msk.bf16.vlgmr.msra.gmra.mxu0 %vm1119_vm4, %v4079_v14  ;;  %2768 = vmatmul.msk.bf16.gmra.mxu3 %vm1119_vm4, %v2261_v44 }
 0x5ce   :  { %v2072_v56 = vpop.f32.mrf.mxu0 }
 0x5cf   :  { %v2195_v54 = vpack.c.bf16 %v2072_v56, %v2072_v56 }
 0x5d1   :  { %v2409_v6 = vunpack.c.l.b16 %v2195_v54 }
 0x5d2   :  { %2769 = vmatmul.msk.bf16.vlgmr.msra.gmra.mxu1 %vm1119_vm4, %v2298_v12 }
 0x5d3   :  { %v2412_v37 = vpack.c.b16 %v2409_v6, %v2408_v23 }
 0x5da   :  { %2766 = vmatmul.msk.bf16.gmra.mxu0 %vm1119_vm4, %v2223_v51  ;;  %2775 = vmatmul.msk.bf16.vlgmr.msrb.gmra.mxu3 %vm1119_vm4, %v2412_v37 }
 0x5e2   :  { %2770 = vmatmul.msk.bf16.gmra.mxu1 %vm1119_vm4, %v2299_v43 }
 0x5ea   :  { %2773 = vmatmul.msk.bf16.vlgmr.msrb.gmra.mxu0 %vm1119_vm4, %v2374_v24 }
 0x5fa   :  { %2774 = vmatmul.msk.bf16.gmra.mxu0 %vm1119_vm4, %v2375_v15  ;;  %v2824_v15 = vld [vmem:[%s4055_s11 + $0x18] sm:$0xff] }
 0x5fb   :  { %2620 = vmatpush.bf16.msra.mxu3 %v2824_v15 }
 0x615   :  { %v2117_v48 = vpop.f32.mrf.mxu3 }
 0x616   :  { %v2198_v19 = vpack.c.bf16 %v2117_v48, %v2117_v48 }
 0x617   :  { %v2164_v30 = vpop.f32.mrf.mxu1 }
 0x618   :  { %v2202_v8 = vpack.c.bf16 %v2164_v30, %v2164_v30  ;;  %v2446_v16 = vunpack.c.l.b16 %v2198_v19 }
 0x61a   :  { %v2484_v38 = vunpack.c.l.b16 %v2202_v8 }
 0x61d   :  { %v2119_v60 = vpop.f32.mrf.mxu3 }
 0x61e   :  { %v2199_v26 = vpack.c.bf16 %v2119_v60, %v2119_v60  ;;  %v2356_v23 = vpop.f32.mrf.mxu2 }
 0x61f   :  { %v2166_v9 = vpop.f32.mrf.mxu1 }
 0x620   :  { %v2447_v34 = vunpack.c.l.b16 %v2199_v26  ;;  %v2203_v21 = vpack.c.bf16 %v2166_v9, %v2166_v9 }
 0x622   :  { %v2450_v62 = vpack.c.b16 %v2447_v34, %v2446_v16  ;;  %v2485_v4 = vunpack.c.l.b16 %v2203_v21 }
 0x624   :  { %v2488_v49 = vpack.c.b16 %v2485_v4, %v2484_v38  ;;  %2777 = vmatmul.msk.bf16.vlgmr.msrb.gmra.mxu1 %vm1119_vm4, %v2450_v62 }
 0x626   :  { %2779 = vmatmul.msk.bf16.vlgmr.msra.gmra.mxu2 %vm1119_vm4, %v2488_v49  ;;  %v2358_v0 = vpop.f32.mrf.mxu2 }
 0x62d   :  { %v2122_v33 = vpop.f32.mrf.mxu3 }
 0x62e   :  { %v2200_v63 = vpack.c.bf16 %v2122_v33, %v2122_v33  ;;  %v2361_v43 = vpop.f32.mrf.mxu2 }
 0x630   :  { %v2448_v41 = vunpack.c.l.b16 %v2200_v63 }
 0x635   :  { %v2124_v59 = vpop.f32.mrf.mxu3 }
 0x636   :  { %v2201_v20 = vpack.c.bf16 %v2124_v59, %v2124_v59  ;;  %v2363_v45 = vpop.f32.mrf.mxu2 }
 0x637   :  { %v2075_v25 = vpop.f32.mrf.mxu0 }
 0x638   :  { %v2449_v55 = vunpack.c.l.b16 %v2201_v20  ;;  %v2196_v18 = vpack.c.bf16 %v2075_v25, %v2075_v25 }
 0x63a   :  { %v2451_v44 = vpack.c.b16 %v2449_v55, %v2448_v41  ;;  %v2410_v14 = vunpack.c.l.b16 %v2196_v18 }
 0x63c   :  { %2778 = vmatmul.msk.bf16.gmra.mxu1 %vm1119_vm4, %v2451_v44 }
 0x63d   :  { %v2280_v1 = vpop.f32.mrf.mxu3 }
 0x63f   :  { %v2077_v53 = vpop.f32.mrf.mxu0  ;;  %v2169_v50 = vpop.f32.mrf.mxu1 }
 0x640   :  { %v2197_v13 = vpack.c.bf16 %v2077_v53, %v2077_v53  ;;  %v2204_v56 = vpack.c.bf16 %v2169_v50, %v2169_v50 }
 0x642   :  { %v2411_v22 = vunpack.c.l.b16 %v2197_v13  ;;  %v2486_v12 = vunpack.c.l.b16 %v2204_v56  ;;  %v3011_v56 = vld [vmem:[%s4053_s9] ss:$0 sm:$0xff] }
 0x644   :  { %v2413_v40 = vpack.c.b16 %v2411_v22, %v2410_v14 }
 0x645   :  { %v2282_v51 = vpop.f32.mrf.mxu3 }
 0x646   :  { %2776 = vmatmul.msk.bf16.gmra.mxu3 %vm1119_vm4, %v2413_v40 }
 0x647   :  { %v2171_v2 = vpop.f32.mrf.mxu1  ;;  %v2242_v29 = vpop.f32.mrf.mxu0 }
 0x648   :  { %v2205_v17 = vpack.c.bf16 %v2171_v2, %v2171_v2  ;;  %v2518_v19 = vadd.f32 %v2280_v1, %v2242_v29 }
 0x64a   :  { %v2487_v54 = vunpack.c.l.b16 %v2205_v17 }
 0x64c   :  { %v2489_v42 = vpack.c.b16 %v2487_v54, %v2486_v12 }
 0x64d   :  { %v2285_v5 = vpop.f32.mrf.mxu3 }
 0x64e   :  { %2780 = vmatmul.msk.bf16.gmra.mxu2 %vm1119_vm4, %v2489_v42 }
 0x64f   :  { %v2244_v6 = vpop.f32.mrf.mxu0  ;;  %v2318_v58 = vpop.f32.mrf.mxu1 }
 0x650   :  { %v2519_v39 = vadd.f32 %v2282_v51, %v2244_v6  ;;  %v2522_v9 = vadd.f32 %v2518_v19, %v2318_v58  ;;  %v2823_v51 = vld [vmem:[%s4055_s11 + $0x10] sm:$0xff] }
 0x651   :  { %2621 = vmatpush.bf16.msra.mxu3 %v2823_v51 }
 0x652   :  { %v2526_v33 = vadd.f32 %v2522_v9, %v2356_v23  ;;  %v2820_v23 = vld [vmem:[%s4054_s10] sm:$0xff] }
 0x655   :  { %v2287_v61 = vpop.f32.mrf.mxu3 }
 0x657   :  { %v2247_v46 = vpop.f32.mrf.mxu0  ;;  %v2320_v37 = vpop.f32.mrf.mxu1 }
 0x658   :  { %v2520_v7 = vadd.f32 %v2285_v5, %v2247_v46  ;;  %v2523_v60 = vadd.f32 %v2519_v39, %v2320_v37  ;;  %v2822_v46 = vld [vmem:[%s4055_s11 + $0x8] sm:$0xff]  ;;  %v2821_v37 = vld [vmem:[%s4055_s11] sm:$0xff]  ;;  %s2638_s11 = sshll.u32 %s4056_s12, 4  ;;  %s2639_s11 = int_to_ptr.hbm [resolvable:$true] %s2638_s11 }
 0x659   :  { %2622 = vmatpush.bf16.msra.mxu3 %v2822_v46 }
 0x65a   :  { %v2527_v21 = vadd.f32 %v2523_v60, %v2358_v0 }
 0x65d   :  { %v2432_v35 = vpop.f32.mrf.mxu3  ;;  %2623 = vmatpush.bf16.msra.mxu3 %v2821_v37 }
 0x65f   :  { %v2249_v57 = vpop.f32.mrf.mxu0  ;;  %v2323_v47 = vpop.f32.mrf.mxu1 }
 0x660   :  { %v2521_v48 = vadd.f32 %v2287_v61, %v2249_v57  ;;  %v2524_v30 = vadd.f32 %v2520_v7, %v2323_v47  ;;  %v3012_v47 = vld [vmem:[%s4053_s9 + $0x1] ss:$0 sm:$0xff] }
 0x662   :  { %v2528_v16 = vadd.f32 %v2524_v30, %v2361_v43 }
 0x665   :  { %v2434_v27 = vpop.f32.mrf.mxu3 }
 0x667   :  { %v2394_v11 = vpop.f32.mrf.mxu0  ;;  %v2325_v32 = vpop.f32.mrf.mxu1 }
 0x668   :  { %v2525_v8 = vadd.f32 %v2521_v48, %v2325_v32  ;;  %v2530_v25 = vadd.f32 %v2526_v33, %v2394_v11 }
 0x66a   :  { %v2529_v62 = vadd.f32 %v2525_v8, %v2363_v45  ;;  %v2534_v53 = vadd.f32 %v2530_v25, %v2432_v35 }
 0x66f   :  { %v2396_v24 = vpop.f32.mrf.mxu0 }
 0x670   :  { %v2531_v63 = vadd.f32 %v2527_v21, %v2396_v24 }
 0x672   :  { %v2535_v55 = vadd.f32 %v2531_v63, %v2434_v27 }
 0x677   :  { %v2399_v28 = vpop.f32.mrf.mxu0 }
 0x678   :  { %v2532_v38 = vadd.f32 %v2528_v16, %v2399_v28 }
 0x67f   :  { %v2401_v34 = vpop.f32.mrf.mxu0 }
 0x680   :  { %v2533_v59 = vadd.f32 %v2529_v62, %v2401_v34 }
 0x6a1   :  { %v2470_v36 = vpop.f32.mrf.mxu1 }
 0x6a2   :  { %v2538_v40 = vadd.f32 %v2534_v53, %v2470_v36 }
 0x6a9   :  { %v2508_v52 = vpop.f32.mrf.mxu2  ;;  %v2472_v31 = vpop.f32.mrf.mxu1 }
 0x6aa   :  { %v2539_v50 = vadd.f32 %v2535_v55, %v2472_v31  ;;  %v2542_v12 = vadd.f32 %v2538_v40, %v2508_v52 }
 0x6ac   :  { %v2548_v6 = vadd.f32 %v3011_v56, %v2542_v12 }
 0x6b1   :  { %v2510_v3 = vpop.f32.mrf.mxu2 }
 0x6b2   :  { %v2543_v2 = vadd.f32 %v2539_v50, %v2510_v3 }
 0x6b4   :  { %v2549_v29 = vadd.f32 %v3011_v56, %v2543_v2 }
 0x6b6   :  { %v2554_v58 = vpack.c.bf16 %v2549_v29, %v2548_v6 }
 0x6b9   :  { %v2475_v26 = vpop.f32.mrf.mxu1 }
 0x6c1   :  { %v2477_v18 = vpop.f32.mrf.mxu1 }
 0x6c9   :  { %v2437_v10 = vpop.f32.mrf.mxu3 }
 0x6ca   :  { %v2536_v20 = vadd.f32 %v2532_v38, %v2437_v10 }
 0x6cc   :  { %v2540_v44 = vadd.f32 %v2536_v20, %v2475_v26 }
 0x6d1   :  { %v2439_v4 = vpop.f32.mrf.mxu3  ;;  %v2513_v49 = vpop.f32.mrf.mxu2 }
 0x6d2   :  { %v2537_v41 = vadd.f32 %v2533_v59, %v2439_v4  ;;  %v2544_v13 = vadd.f32 %v2540_v44, %v2513_v49 }
 0x6d4   :  { %v2541_v14 = vadd.f32 %v2537_v41, %v2477_v18  ;;  %v2550_v54 = vadd.f32 %v3011_v56, %v2544_v13 }
 0x6d9   :  { %v2515_v22 = vpop.f32.mrf.mxu2 }
 0x6da   :  { %v2545_v17 = vadd.f32 %v2541_v14, %v2515_v22 }
 0x6dc   :  { %v2551_v42 = vadd.f32 %v3011_v56, %v2545_v17 }
 0x6de   :  { %v2555_v1 = vpack.c.bf16 %v2551_v42, %v2550_v54 }
 0x6e0   :  { %2570 = vmatpush.bf16.msra.mxu0 %v2555_v1 }
 0x6e4   :  { %2571 = vmatpush.bf16.msra.mxu0 %v2554_v58 }
 0x6e7   :  { %2785 = vmatmul.msk.bf16.vlgmr.msra.gmra.mxu0 %vm64_vm0, %v2820_v23 }
 0x764   :  { %v2573_v0 = vpop.f32.mrf.mxu0 }
 0x76c   :  { %v2575_v5 = vpop.f32.mrf.mxu0 }
 0x76d   :  { %v2578_v57 = vpack.c.bf16 %v2575_v5, %v2573_v0 }
 0x76f   :  { %2802 = vmatmul.msk.bf16.vlgmr.msra.gmra.mxu3 %vm415_vm3, %v2578_v57 }
 0x7f2   :  { %v2625_v43 = vpop.f32.mrf.mxu3 }
 0x7f3   :  { %v2626_v61 = vadd.f32 %v3012_v47, %v2625_v43 }
 0x7f5   :  { %2630 = vst.msk [vmem:[#allocation2] sm:$0xff] %vm415_vm3, %v2626_v61 }
 0x7fa   :  { %v2627_v11 = vpop.f32.mrf.mxu3 }
 0x7fb   :  { %v2628_v32 = vadd.f32 %v3012_v47, %v2627_v11 }
 0x7fd   :  { %2631 = vst.msk [vmem:[#allocation2 + $0x8] sm:$0xff] %vm415_vm3, %v2628_v32 }
 0x7fe   :  { %2644 = dma.vmem_to_hbm [thread:$0]  %s2637_s2, 256, %s2639_s11, [#allocation3], %s3169_s17, %s3169_s17, %s3170_s18  }
 0x7ff   :  { %3165 = dma.done.wait [#allocation3], 256  }
 0x800   :  { %3166 = vsyncadd [#allocation3], 4294967040 }
 0x801   :  { %2649 = vsyncpa [#allocation3], 1 }

</bundles_post_ra>
